<compile_context>
chip_gen: v5e
topology: v5e:2x2
jax: 0.10.0
libtpu: 0.0.40
codegen_flags: <defaults>
</compile_context>

<pallas_src>
import math

import jax
import jax.numpy as jnp
from jax.experimental import pallas as pl
from jax.experimental.pallas import tpu as pltpu

D_MODELS = [32, 16]          # component widths
NUM_HEADS = [4, 2]           # heads per component attention (uniform d_head = 8)
KERNEL_WIDTH = 3             # band width of the banded attention
DILATION_RATES = [1, 2]      # TODO(synk): dilation_rates / supersampling of BandedMultiheadedAttention
SUPERSAMPLING = [1, 1]       #             are not reproduced; a plain zero-padded width-3 band is used.
DROPOUT = 0.1                # eval mode -> identity
LN_EPS = 1e-5
NEG_INF = -1e30
VEC_COLS = 16                # lane width of the packed bias / LayerNorm slab
USE_BF16_MATMUL = False      # set True on v6e/v7x to feed the MXU bf16 (small numeric deviation)


# ----------------------------------------------------------------------------
# Host-side helpers
# ----------------------------------------------------------------------------

def _tc_count():
    """TensorCores per chip: v7x has 2, v5e/v6e have 1 (default 1 if unknown)."""
    try:
        kind = jax.devices()[0].device_kind.lower()
    except Exception:
        return 1
    return 2 if "v7" in kind else 1


def _choose_blocks(rows_real, seq):
    """Rows (lanes) per grid block + block count for the transposed layout.

    Blocks are multiples of lcm(seq, 128) so each block is lane-dense, starts at a
    sequence boundary and pltpu.roll operates on a 128-aligned lane extent.
    Single-TC chips (v5e/v6e) prefer ONE big block; v7x (2 TCs) prefers >= 2 blocks.
    """
    quantum = (seq * 128) // math.gcd(seq, 128)      # lcm(seq, 128)
    units = -(-rows_real // quantum)                 # quantum units after padding
    n_tc = _tc_count()
    cap = max(1, 2048 // quantum)                    # ~2048 rows/block keeps VMEM comfy
    nblocks = max(n_tc if units >= n_tc else 1, -(-units // cap))
    upb = -(-units // nblocks)
    rblk = upb * quantum
    nblocks = -(-units // upb)
    return rblk, nblocks


def _band_mask(rblk, seq, kernel_width, nh_pad):
    """(n_off*nh_pad, rblk) additive mask: 0 where the banded offset stays inside its
    sequence, NEG_INF otherwise (also kills roll wrap-around / cross-sequence leaks)."""
    half_w = kernel_width // 2
    pos = (jnp.arange(rblk, dtype=jnp.int32) % seq)[None, :]
    rows = []
    for o in range(-half_w, half_w + 1):
        valid = (pos + o >= 0) & (pos + o < seq)
        rows.append(jnp.where(valid, 0.0, NEG_INF).astype(jnp.float32))
    return jnp.repeat(jnp.concatenate(rows, axis=0), nh_pad, axis=0)


def _blockdiag(mats):
    rows = sum(m.shape[0] for m in mats)
    cols = sum(m.shape[1] for m in mats)
    out = jnp.zeros((rows, cols), jnp.float32)
    r = c = 0
    for m in mats:
        out = out.at[r:r + m.shape[0], c:c + m.shape[1]].set(m)
        r += m.shape[0]
        c += m.shape[1]
    return out


def _const_spec(shape):
    nd = len(shape)
    return pl.BlockSpec(shape, lambda g, _nd=nd: (0,) * _nd)


# ----------------------------------------------------------------------------
# Fused kernel (transposed, lane-dense layout: (feature, row))
# ----------------------------------------------------------------------------

def make_fused_kernel(rblk, d_total, d_models, num_heads, kernel_width):
    D = d_total
    dC = sum(d_models)                   # concatenated component width (== D here)
    nH = sum(num_heads)
    d_head = d_models[0] // num_heads[0]
    nh_pad = -(-nH // 8) * 8             # heads padded to a sublane multiple
    n_off = kernel_width
    half_w = kernel_width // 2
    offsets = list(range(-half_w, half_w + 1))
    scale = 1.0 / math.sqrt(d_head)

    # Row offsets inside the width-D weight slab (must match _pack_params).
    o_wc = 0
    o_wqkv = o_wc + dC
    o_wo = o_wqkv + 3 * dC
    o_wf1 = o_wo + dC
    o_wb = o_wf1 + 4 * dC
    o_cwf1 = o_wb + D
    o_seg = o_cwf1 + 4 * D

    mm_dtype = jnp.bfloat16 if USE_BF16_MATMUL else jnp.float32

    def mm(a, b):                        # weight matmuls (MXU), f32 accumulate
        return jnp.dot(a.astype(mm_dtype), b.astype(mm_dtype),
                       preferred_element_type=jnp.float32)

    def kernel(x_ref, s48_ref, s192_ref, hmt3_ref, hm3_ref, vec_ref, mask_ref, out_ref):
        xT = x_ref[...]                  # (D, rblk): features on sublanes, rows on lanes
        vec = vec_ref[...]               # (4D, VEC_COLS) packed biases / LN params

        def col(idx, rows):              # (rows, 1) column, broadcasts along lanes
            return vec[0:rows, idx:idx + 1]

        seg_avg = s48_ref[o_seg:o_seg + dC, :]        # per-component averaging matrix

        def seg_ln(t, g, b):             # segmented (per-component) LayerNorm via MXU
            mu = jnp.dot(seg_avg, t, preferred_element_type=jnp.float32)
            var = jnp.dot(seg_avg, (t - mu) ** 2, preferred_element_type=jnp.float32)
            return (t - mu) * jax.lax.rsqrt(var + LN_EPS) * g + b

        # Converter.components (both components fused): (dC, R)
        comp = mm(s48_ref[o_wc:o_wc + dC, :], xT)

        # Fused QKV for all components / heads: (3*dC, R)
        qkv = mm(s48_ref[o_wqkv:o_wqkv + 3 * dC, :], comp) + col(0, 3 * dC)
        q = qkv[0:dC]
        k = qkv[dC:2 * dC]
        v = qkv[2 * dC:3 * dC]

        # Width-`kernel_width` banded attention. Sequence positions live on the lane
        # axis, so the neighbour shifts are XLU lane rotations; wrap-around and
        # cross-sequence leakage are removed by the precomputed additive band mask.
        def shifted(t, o):               # shifted(t, o)[:, i] == t[:, i + o] (wrapped)
            return t if o == 0 else pltpu.roll(t, shift=(-o) % rblk, axis=1)

        k_sh = [shifted(k, o) for o in offsets]
        v_sh = [shifted(v, o) for o in offsets]

        qk = jnp.concatenate([q * ks for ks in k_sh], axis=0)           # (n_off*dC, R)
        s = jnp.dot(hmt3_ref[...], qk,
                    preferred_element_type=jnp.float32) * scale + mask_ref[...]
        blocks = [s[i * nh_pad:(i + 1) * nh_pad] for i in range(n_off)]
        m = blocks[0]
        for blk in blocks[1:]:
            m = jnp.maximum(m, blk)
        exps = [jnp.exp(blk - m) for blk in blocks]
        denom = exps[0]
        for e in exps[1:]:
            denom = denom + e
        inv = pl.reciprocal(denom, approx=True)                         # EUP slot
        w = jnp.concatenate([e * inv for e in exps], axis=0)            # (n_off*nh_pad, R)
        wf = jnp.dot(hm3_ref[...], w, preferred_element_type=jnp.float32)  # (n_off*dC, R)
        attn = wf[0:dC] * v_sh[0]
        for i in range(1, n_off):
            attn = attn + wf[i * dC:(i + 1) * dC] * v_sh[i]
        attn = mm(s48_ref[o_wo:o_wo + dC, :], attn) + col(1, dC)

        # residual + per-component LayerNorm (dropout is identity in eval mode)
        y = seg_ln(comp + attn, col(2, dC), col(3, dC))

        # per-component feedforward d -> 4d -> d (block-diagonal, both components fused)
        h = jnp.maximum(mm(s48_ref[o_wf1:o_wf1 + 4 * dC, :], y) + col(4, 4 * dC), 0.0)
        ff = mm(s192_ref[0:dC, :], h) + col(5, dC)
        z = seg_ln(y + ff, col(6, dC), col(7, dC))

        # Converter.composite ('sum' mode) + composite feedforward + final LayerNorm
        composite = mm(s48_ref[o_wb:o_wb + D, :], z)                    # (D, R)
        ch = jnp.maximum(mm(s48_ref[o_cwf1:o_cwf1 + 4 * D, :], composite) + col(8, 4 * D),
                         0.0)
        cff = mm(s192_ref[dC:dC + D, :], ch) + col(9, D)
        t = xT + cff
        mu = jnp.mean(t, axis=0, keepdims=True)
        var = jnp.mean((t - mu) ** 2, axis=0, keepdims=True)
        out_ref[...] = (t - mu) * jax.lax.rsqrt(var + LN_EPS) * col(10, D) + col(11, D)

    return kernel


# ----------------------------------------------------------------------------
# Parameters (PyTorch nn.Linear layout: y = x @ W + b, W is (in, out))
# ----------------------------------------------------------------------------

def init_params(key):
    D = sum(D_MODELS)
    keys = iter(jax.random.split(key, 128))

    def nrm(shape, scale=0.02):
        return (scale * jax.random.normal(next(keys), shape)).astype(jnp.float32)

    params = {"components": []}
    for d in D_MODELS:
        params["components"].append({
            "Wc": nrm((D, d)),
            "Wq": nrm((d, d)), "bq": nrm((1, d)),
            "Wk": nrm((d, d)), "bk": nrm((1, d)),
            "Wv": nrm((d, d)), "bv": nrm((1, d)),
            "Wo": nrm((d, d)), "bo": nrm((1, d)),
            "ln1g": jnp.ones((1, d), jnp.float32), "ln1b": jnp.zeros((1, d), jnp.float32),
            "Wf1": nrm((d, 4 * d)), "bf1": nrm((1, 4 * d)),
            "Wf2": nrm((4 * d, d)), "bf2": nrm((1, d)),
            "ln2g": jnp.ones((1, d), jnp.float32), "ln2b": jnp.zeros((1, d), jnp.float32),
            "Wb": nrm((d, D)),
        })
    params["composite"] = {
        "Wf1": nrm((D, 4 * D)), "bf1": nrm((1, 4 * D)),
        "Wf2": nrm((4 * D, D)), "bf2": nrm((1, D)),
        "lng": jnp.ones((1, D), jnp.float32), "lnb": jnp.zeros((1, D), jnp.float32),
    }
    return params


def _pack_params(params):
    """Pack logical params into the fused transposed-kernel slabs (host-side)."""
    D = sum(D_MODELS)
    dC = D
    nH = sum(NUM_HEADS)
    nh_pad = -(-nH // 8) * 8
    n_off = KERNEL_WIDTH
    d_head = D_MODELS[0] // NUM_HEADS[0]
    comps = params["components"]
    cp = params["composite"]

    # Fused (concatenated / block-diagonal) weights, still in y = x @ W layout.
    Wc = jnp.concatenate([c["Wc"] for c in comps], axis=1)                  # (D, dC)
    Wqkv = jnp.concatenate([_blockdiag([c["Wq"] for c in comps]),
                            _blockdiag([c["Wk"] for c in comps]),
                            _blockdiag([c["Wv"] for c in comps])], axis=1)  # (dC, 3dC)
    Wo = _blockdiag([c["Wo"] for c in comps])                               # (dC, dC)
    Wf1 = _blockdiag([c["Wf1"] for c in comps])                             # (dC, 4dC)
    Wf2 = _blockdiag([c["Wf2"] for c in comps])                             # (4dC, dC)
    Wb = jnp.concatenate([c["Wb"] for c in comps], axis=0)                  # (dC, D)

    # Segment-average matrix: per-component LayerNorm reductions on the MXU.
    seg = jnp.zeros((dC, dC), jnp.float32)
    off = 0
    for d in D_MODELS:
        seg = seg.at[off:off + d, off:off + d].set(1.0 / d)
        off += d

    slab48 = jnp.concatenate(
        [Wc.T, Wqkv.T, Wo.T, Wf1.T, Wb.T, cp["Wf1"].T, seg], axis=0)        # (720, D)
    slab192 = jnp.concatenate([Wf2.T, cp["Wf2"].T], axis=0)                 # (2D, 4D)

    # Head-indicator matrices (precomputed host-side), one identical block per offset.
    hm_t = jnp.zeros((nh_pad, dC), jnp.float32)   # head  <- sum over its features
    hm = jnp.zeros((dC, nh_pad), jnp.float32)     # feature <- broadcast from its head
    for hidx in range(nH):
        hm_t = hm_t.at[hidx, hidx * d_head:(hidx + 1) * d_head].set(1.0)
        hm = hm.at[hidx * d_head:(hidx + 1) * d_head, hidx].set(1.0)
    hmt3 = _blockdiag([hm_t] * n_off)             # (n_off*nh_pad, n_off*dC)
    hm3 = _blockdiag([hm] * n_off)                # (n_off*dC, n_off*nh_pad)

    # Bias / LayerNorm column slab (features on sublanes -> broadcasts along lanes).
    cols = [
        jnp.concatenate([c["bq"][0] for c in comps]
                        + [c["bk"][0] for c in comps]
                        + [c["bv"][0] for c in comps]),                     # 0: bqkv (3dC)
        jnp.concatenate([c["bo"][0] for c in comps]),                       # 1: bo
        jnp.concatenate([c["ln1g"][0] for c in comps]),                     # 2: ln1 gamma
        jnp.concatenate([c["ln1b"][0] for c in comps]),                     # 3: ln1 beta
        jnp.concatenate([c["bf1"][0] for c in comps]),                      # 4: bf1 (4dC)
        jnp.concatenate([c["bf2"][0] for c in comps]),                      # 5: bf2
        jnp.concatenate([c["ln2g"][0] for c in comps]),                     # 6: ln2 gamma
        jnp.concatenate([c["ln2b"][0] for c in comps]),                     # 7: ln2 beta
        cp["bf1"][0], cp["bf2"][0], cp["lng"][0], cp["lnb"][0],             # 8..11
    ]
    vec = jnp.zeros((4 * D, VEC_COLS), jnp.float32)
    for i, c in enumerate(cols):
        vec = vec.at[0:c.shape[0], i].set(c)

    return slab48, slab192, hmt3, hm3, vec


# ----------------------------------------------------------------------------
# Wrapper
# ----------------------------------------------------------------------------

def encoder_sublayer(x, params):
    B, S, D = x.shape
    assert D == sum(D_MODELS) and D % 8 == 0
    assert len({d // h for d, h in zip(D_MODELS, NUM_HEADS)}) == 1   # uniform d_head

    rows = B * S
    rblk, nblocks = _choose_blocks(rows, S)
    rpad = rblk * nblocks
    nh_pad = -(-sum(NUM_HEADS) // 8) * 8

    # Lane-dense transposed layout: rows -> lanes (padded to a 128 multiple).
    xT = jnp.transpose(x.reshape(rows, D))                            # (D, rows)
    if rpad > rows:
        xT = jnp.pad(xT, ((0, 0), (0, rpad - rows)))

    slab48, slab192, hmt3, hm3, vec = _pack_params(params)
    mask = _band_mask(rblk, S, KERNEL_WIDTH, nh_pad)
    consts = [slab48, slab192, hmt3, hm3, vec, mask]

    kern = make_fused_kernel(rblk, D, D_MODELS, NUM_HEADS, KERNEL_WIDTH)
    row_spec = pl.BlockSpec((D, rblk), lambda g: (0, g))
    outT = pl.pallas_call(
        kern,
        out_shape=jax.ShapeDtypeStruct((D, rpad), jnp.float32),
        grid=(nblocks,),
        in_specs=[row_spec] + [_const_spec(a.shape) for a in consts],
        out_specs=row_spec,
        compiler_params=pltpu.CompilerParams(
            dimension_semantics=("parallel",),
            vmem_limit_bytes=48 * 1024 * 1024),
    )(xT, *consts)

    return jnp.transpose(outT[:, :rows]).reshape(B, S, D)


if __name__ == "__main__":
    key = jax.random.PRNGKey(0)
    pkey, xkey = jax.random.split(key)
    params = init_params(pkey)

    B, S, D = 2, 8, sum(D_MODELS)
    x = jax.random.normal(xkey, (B, S, D), jnp.float32)

    out = encoder_sublayer(x, params)
    jax.block_until_ready(out)
    assert out.shape == (B, S, D) and out.dtype == jnp.float32
    assert bool(jnp.all(jnp.isfinite(out)))
    print("KERNEL_OK")
</pallas_src>

<mosaic_0001>
module attributes {stable_mosaic.version = 11 : i64} {
  func.func @kernel(%arg0: i32, %arg1: memref<48x128xf32, #tpu.memory_space<vmem>>, %arg2: memref<720x48xf32, #tpu.memory_space<vmem>>, %arg3: memref<96x192xf32, #tpu.memory_space<vmem>>, %arg4: memref<24x144xf32, #tpu.memory_space<vmem>>, %arg5: memref<144x24xf32, #tpu.memory_space<vmem>>, %arg6: memref<192x16xf32, #tpu.memory_space<vmem>>, %arg7: memref<24x128xf32, #tpu.memory_space<vmem>>, %arg8: memref<48x128xf32, #tpu.memory_space<vmem>>) attributes {dimension_semantics = [#tpu.dimension_semantics<parallel>], iteration_bounds = array<i64: 1>, scalar_prefetch = 0 : i64, scratch_operands = 0 : i64, tpu.core_type = #tpu.core_type<tc>, window_params = [{transform_indices = @transform_0, window_bounds = array<i64: 48, 128>}, {pipeline_mode = #tpu.pipeline_mode<synchronous>, transform_indices = @transform_1, window_bounds = array<i64: 720, 48>}, {pipeline_mode = #tpu.pipeline_mode<synchronous>, transform_indices = @transform_2, window_bounds = array<i64: 96, 192>}, {pipeline_mode = #tpu.pipeline_mode<synchronous>, transform_indices = @transform_3, window_bounds = array<i64: 24, 144>}, {pipeline_mode = #tpu.pipeline_mode<synchronous>, transform_indices = @transform_4, window_bounds = array<i64: 144, 24>}, {pipeline_mode = #tpu.pipeline_mode<synchronous>, transform_indices = @transform_5, window_bounds = array<i64: 192, 16>}, {pipeline_mode = #tpu.pipeline_mode<synchronous>, transform_indices = @transform_6, window_bounds = array<i64: 24, 128>}, {transform_indices = @transform_7, window_bounds = array<i64: 48, 128>}]} {
    %c0 = arith.constant 0 : index
    %c0_0 = arith.constant 0 : index
    %0 = vector.load %arg1[%c0, %c0_0] : memref<48x128xf32, #tpu.memory_space<vmem>>, vector<48x128xf32>
    %c0_1 = arith.constant 0 : index
    %c0_2 = arith.constant 0 : index
    %1 = vector.load %arg6[%c0_1, %c0_2] : memref<192x16xf32, #tpu.memory_space<vmem>>, vector<192x16xf32>
    %c672 = arith.constant 672 : index
    %c0_3 = arith.constant 0 : index
    %2 = vector.load %arg2[%c672, %c0_3] : memref<720x48xf32, #tpu.memory_space<vmem>>, vector<48x48xf32>
    %c0_4 = arith.constant 0 : index
    %c0_5 = arith.constant 0 : index
    %3 = vector.load %arg2[%c0_4, %c0_5] : memref<720x48xf32, #tpu.memory_space<vmem>>, vector<48x48xf32>
    %cst = arith.constant dense<0.000000e+00> : vector<48x128xf32>
    %4 = tpu.matmul %3, %0, %cst {dimension_numbers = #tpu.dot_dimension_numbers<[1], [0], [0], [1], [0, 0, 1, 1], [], []>} : vector<48x48xf32>, vector<48x128xf32>, vector<48x128xf32> -> vector<48x128xf32>
    %c48 = arith.constant 48 : index
    %c0_6 = arith.constant 0 : index
    %5 = vector.load %arg2[%c48, %c0_6] : memref<720x48xf32, #tpu.memory_space<vmem>>, vector<144x48xf32>
    %cst_7 = arith.constant dense<0.000000e+00> : vector<144x128xf32>
    %6 = tpu.matmul %5, %4, %cst_7 {dimension_numbers = #tpu.dot_dimension_numbers<[1], [0], [0], [1], [0, 0, 1, 1], [], []>} : vector<144x48xf32>, vector<48x128xf32>, vector<144x128xf32> -> vector<144x128xf32>
    %7 = vector.extract_strided_slice %1 {offsets = [0, 0], sizes = [144, 1], strides = [1, 1]} : vector<192x16xf32> to vector<144x1xf32>
    %8 = vector.broadcast %7 : vector<144x1xf32> to vector<144x128xf32>
    %9 = arith.addf %6, %8 : vector<144x128xf32>
    %10 = vector.extract_strided_slice %9 {offsets = [0, 0], sizes = [48, 128], strides = [1, 1]} : vector<144x128xf32> to vector<48x128xf32>
    %11 = vector.extract_strided_slice %9 {offsets = [48, 0], sizes = [48, 128], strides = [1, 1]} : vector<144x128xf32> to vector<48x128xf32>
    %12 = vector.extract_strided_slice %9 {offsets = [96, 0], sizes = [48, 128], strides = [1, 1]} : vector<144x128xf32> to vector<48x128xf32>
    %c1_i32 = arith.constant 1 : i32
    %13 = tpu.dynamic_rotate %11 by %c1_i32 dim 1 : vector<48x128xf32>, i32 -> vector<48x128xf32>
    %c127_i32 = arith.constant 127 : i32
    %14 = tpu.dynamic_rotate %11 by %c127_i32 dim 1 : vector<48x128xf32>, i32 -> vector<48x128xf32>
    %c1_i32_8 = arith.constant 1 : i32
    %15 = tpu.dynamic_rotate %12 by %c1_i32_8 dim 1 : vector<48x128xf32>, i32 -> vector<48x128xf32>
    %c127_i32_9 = arith.constant 127 : i32
    %16 = tpu.dynamic_rotate %12 by %c127_i32_9 dim 1 : vector<48x128xf32>, i32 -> vector<48x128xf32>
    %17 = arith.mulf %10, %13 : vector<48x128xf32>
    %18 = arith.mulf %10, %11 : vector<48x128xf32>
    %19 = arith.mulf %10, %14 : vector<48x128xf32>
    %20 = tpu.concatenate %17, %18, %19 in 0 : vector<48x128xf32>, vector<48x128xf32>, vector<48x128xf32> -> vector<144x128xf32>
    %c0_10 = arith.constant 0 : index
    %c0_11 = arith.constant 0 : index
    %21 = vector.load %arg4[%c0_10, %c0_11] : memref<24x144xf32, #tpu.memory_space<vmem>>, vector<24x144xf32>
    %cst_12 = arith.constant dense<0.000000e+00> : vector<24x128xf32>
    %22 = tpu.matmul %21, %20, %cst_12 {dimension_numbers = #tpu.dot_dimension_numbers<[1], [0], [0], [1], [0, 0, 1, 1], [], []>} : vector<24x144xf32>, vector<144x128xf32>, vector<24x128xf32> -> vector<24x128xf32>
    %cst_13 = arith.constant 0.353553385 : f32
    %23 = vector.broadcast %cst_13 : f32 to vector<24x128xf32>
    %24 = arith.mulf %22, %23 : vector<24x128xf32>
    %c0_14 = arith.constant 0 : index
    %c0_15 = arith.constant 0 : index
    %25 = vector.load %arg7[%c0_14, %c0_15] : memref<24x128xf32, #tpu.memory_space<vmem>>, vector<24x128xf32>
    %26 = arith.addf %24, %25 : vector<24x128xf32>
    %27 = vector.extract_strided_slice %26 {offsets = [0, 0], sizes = [8, 128], strides = [1, 1]} : vector<24x128xf32> to vector<8x128xf32>
    %28 = vector.extract_strided_slice %26 {offsets = [8, 0], sizes = [8, 128], strides = [1, 1]} : vector<24x128xf32> to vector<8x128xf32>
    %29 = vector.extract_strided_slice %26 {offsets = [16, 0], sizes = [8, 128], strides = [1, 1]} : vector<24x128xf32> to vector<8x128xf32>
    %30 = arith.maximumf %27, %28 : vector<8x128xf32>
    %31 = arith.maximumf %30, %29 : vector<8x128xf32>
    %32 = arith.subf %27, %31 : vector<8x128xf32>
    %33 = math.exp %32 : vector<8x128xf32>
    %34 = arith.subf %28, %31 : vector<8x128xf32>
    %35 = math.exp %34 : vector<8x128xf32>
    %36 = arith.subf %29, %31 : vector<8x128xf32>
    %37 = math.exp %36 : vector<8x128xf32>
    %38 = arith.addf %33, %35 : vector<8x128xf32>
    %39 = arith.addf %38, %37 : vector<8x128xf32>
    %40 = tpu.reciprocal %39 {approx = true} : vector<8x128xf32> -> vector<8x128xf32>
    %41 = arith.mulf %33, %40 : vector<8x128xf32>
    %42 = arith.mulf %35, %40 : vector<8x128xf32>
    %43 = arith.mulf %37, %40 : vector<8x128xf32>
    %44 = tpu.concatenate %41, %42, %43 in 0 : vector<8x128xf32>, vector<8x128xf32>, vector<8x128xf32> -> vector<24x128xf32>
    %c0_16 = arith.constant 0 : index
    %c0_17 = arith.constant 0 : index
    %45 = vector.load %arg5[%c0_16, %c0_17] : memref<144x24xf32, #tpu.memory_space<vmem>>, vector<144x24xf32>
    %cst_18 = arith.constant dense<0.000000e+00> : vector<144x128xf32>
    %46 = tpu.matmul %45, %44, %cst_18 {dimension_numbers = #tpu.dot_dimension_numbers<[1], [0], [0], [1], [0, 0, 1, 1], [], []>} : vector<144x24xf32>, vector<24x128xf32>, vector<144x128xf32> -> vector<144x128xf32>
    %47 = vector.extract_strided_slice %46 {offsets = [0, 0], sizes = [48, 128], strides = [1, 1]} : vector<144x128xf32> to vector<48x128xf32>
    %48 = arith.mulf %47, %15 : vector<48x128xf32>
    %49 = vector.extract_strided_slice %46 {offsets = [48, 0], sizes = [48, 128], strides = [1, 1]} : vector<144x128xf32> to vector<48x128xf32>
    %50 = arith.mulf %49, %12 : vector<48x128xf32>
    %51 = arith.addf %48, %50 : vector<48x128xf32>
    %52 = vector.extract_strided_slice %46 {offsets = [96, 0], sizes = [48, 128], strides = [1, 1]} : vector<144x128xf32> to vector<48x128xf32>
    %53 = arith.mulf %52, %16 : vector<48x128xf32>
    %54 = arith.addf %51, %53 : vector<48x128xf32>
    %c192 = arith.constant 192 : index
    %c0_19 = arith.constant 0 : index
    %55 = vector.load %arg2[%c192, %c0_19] : memref<720x48xf32, #tpu.memory_space<vmem>>, vector<48x48xf32>
    %cst_20 = arith.constant dense<0.000000e+00> : vector<48x128xf32>
    %56 = tpu.matmul %55, %54, %cst_20 {dimension_numbers = #tpu.dot_dimension_numbers<[1], [0], [0], [1], [0, 0, 1, 1], [], []>} : vector<48x48xf32>, vector<48x128xf32>, vector<48x128xf32> -> vector<48x128xf32>
    %57 = vector.extract_strided_slice %1 {offsets = [0, 1], sizes = [48, 1], strides = [1, 1]} : vector<192x16xf32> to vector<48x1xf32>
    %58 = vector.broadcast %57 : vector<48x1xf32> to vector<48x128xf32>
    %59 = arith.addf %56, %58 : vector<48x128xf32>
    %60 = arith.addf %4, %59 : vector<48x128xf32>
    %61 = vector.extract_strided_slice %1 {offsets = [0, 2], sizes = [48, 1], strides = [1, 1]} : vector<192x16xf32> to vector<48x1xf32>
    %62 = vector.extract_strided_slice %1 {offsets = [0, 3], sizes = [48, 1], strides = [1, 1]} : vector<192x16xf32> to vector<48x1xf32>
    %cst_21 = arith.constant dense<0.000000e+00> : vector<48x128xf32>
    %63 = tpu.matmul %2, %60, %cst_21 {dimension_numbers = #tpu.dot_dimension_numbers<[1], [0], [0], [1], [0, 0, 1, 1], [], []>} : vector<48x48xf32>, vector<48x128xf32>, vector<48x128xf32> -> vector<48x128xf32>
    %64 = arith.subf %60, %63 : vector<48x128xf32>
    %65 = arith.mulf %64, %64 : vector<48x128xf32>
    %cst_22 = arith.constant dense<0.000000e+00> : vector<48x128xf32>
    %66 = tpu.matmul %2, %65, %cst_22 {dimension_numbers = #tpu.dot_dimension_numbers<[1], [0], [0], [1], [0, 0, 1, 1], [], []>} : vector<48x48xf32>, vector<48x128xf32>, vector<48x128xf32> -> vector<48x128xf32>
    %67 = arith.subf %60, %63 : vector<48x128xf32>
    %cst_23 = arith.constant 9.99999974E-6 : f32
    %68 = vector.broadcast %cst_23 : f32 to vector<48x128xf32>
    %69 = arith.addf %66, %68 : vector<48x128xf32>
    %70 = math.rsqrt %69 : vector<48x128xf32>
    %71 = arith.mulf %67, %70 : vector<48x128xf32>
    %72 = vector.broadcast %61 : vector<48x1xf32> to vector<48x128xf32>
    %73 = arith.mulf %71, %72 : vector<48x128xf32>
    %74 = vector.broadcast %62 : vector<48x1xf32> to vector<48x128xf32>
    %75 = arith.addf %73, %74 : vector<48x128xf32>
    %c240 = arith.constant 240 : index
    %c0_24 = arith.constant 0 : index
    %76 = vector.load %arg2[%c240, %c0_24] : memref<720x48xf32, #tpu.memory_space<vmem>>, vector<192x48xf32>
    %cst_25 = arith.constant dense<0.000000e+00> : vector<192x128xf32>
    %77 = tpu.matmul %76, %75, %cst_25 {dimension_numbers = #tpu.dot_dimension_numbers<[1], [0], [0], [1], [0, 0, 1, 1], [], []>} : vector<192x48xf32>, vector<48x128xf32>, vector<192x128xf32> -> vector<192x128xf32>
    %78 = vector.extract_strided_slice %1 {offsets = [0, 4], sizes = [192, 1], strides = [1, 1]} : vector<192x16xf32> to vector<192x1xf32>
    %79 = vector.broadcast %78 : vector<192x1xf32> to vector<192x128xf32>
    %80 = arith.addf %77, %79 : vector<192x128xf32>
    %cst_26 = arith.constant 0.000000e+00 : f32
    %81 = vector.broadcast %cst_26 : f32 to vector<192x128xf32>
    %82 = arith.maximumf %80, %81 : vector<192x128xf32>
    %c0_27 = arith.constant 0 : index
    %c0_28 = arith.constant 0 : index
    %83 = vector.load %arg3[%c0_27, %c0_28] : memref<96x192xf32, #tpu.memory_space<vmem>>, vector<48x192xf32>
    %cst_29 = arith.constant dense<0.000000e+00> : vector<48x128xf32>
    %84 = tpu.matmul %83, %82, %cst_29 {dimension_numbers = #tpu.dot_dimension_numbers<[1], [0], [0], [1], [0, 0, 1, 1], [], []>} : vector<48x192xf32>, vector<192x128xf32>, vector<48x128xf32> -> vector<48x128xf32>
    %85 = vector.extract_strided_slice %1 {offsets = [0, 5], sizes = [48, 1], strides = [1, 1]} : vector<192x16xf32> to vector<48x1xf32>
    %86 = vector.broadcast %85 : vector<48x1xf32> to vector<48x128xf32>
    %87 = arith.addf %84, %86 : vector<48x128xf32>
    %88 = arith.addf %75, %87 : vector<48x128xf32>
    %89 = vector.extract_strided_slice %1 {offsets = [0, 6], sizes = [48, 1], strides = [1, 1]} : vector<192x16xf32> to vector<48x1xf32>
    %90 = vector.extract_strided_slice %1 {offsets = [0, 7], sizes = [48, 1], strides = [1, 1]} : vector<192x16xf32> to vector<48x1xf32>
    %cst_30 = arith.constant dense<0.000000e+00> : vector<48x128xf32>
    %91 = tpu.matmul %2, %88, %cst_30 {dimension_numbers = #tpu.dot_dimension_numbers<[1], [0], [0], [1], [0, 0, 1, 1], [], []>} : vector<48x48xf32>, vector<48x128xf32>, vector<48x128xf32> -> vector<48x128xf32>
    %92 = arith.subf %88, %91 : vector<48x128xf32>
    %93 = arith.mulf %92, %92 : vector<48x128xf32>
    %cst_31 = arith.constant dense<0.000000e+00> : vector<48x128xf32>
    %94 = tpu.matmul %2, %93, %cst_31 {dimension_numbers = #tpu.dot_dimension_numbers<[1], [0], [0], [1], [0, 0, 1, 1], [], []>} : vector<48x48xf32>, vector<48x128xf32>, vector<48x128xf32> -> vector<48x128xf32>
    %95 = arith.subf %88, %91 : vector<48x128xf32>
    %cst_32 = arith.constant 9.99999974E-6 : f32
    %96 = vector.broadcast %cst_32 : f32 to vector<48x128xf32>
    %97 = arith.addf %94, %96 : vector<48x128xf32>
    %98 = math.rsqrt %97 : vector<48x128xf32>
    %99 = arith.mulf %95, %98 : vector<48x128xf32>
    %100 = vector.broadcast %89 : vector<48x1xf32> to vector<48x128xf32>
    %101 = arith.mulf %99, %100 : vector<48x128xf32>
    %102 = vector.broadcast %90 : vector<48x1xf32> to vector<48x128xf32>
    %103 = arith.addf %101, %102 : vector<48x128xf32>
    %c432 = arith.constant 432 : index
    %c0_33 = arith.constant 0 : index
    %104 = vector.load %arg2[%c432, %c0_33] : memref<720x48xf32, #tpu.memory_space<vmem>>, vector<48x48xf32>
    %cst_34 = arith.constant dense<0.000000e+00> : vector<48x128xf32>
    %105 = tpu.matmul %104, %103, %cst_34 {dimension_numbers = #tpu.dot_dimension_numbers<[1], [0], [0], [1], [0, 0, 1, 1], [], []>} : vector<48x48xf32>, vector<48x128xf32>, vector<48x128xf32> -> vector<48x128xf32>
    %c480 = arith.constant 480 : index
    %c0_35 = arith.constant 0 : index
    %106 = vector.load %arg2[%c480, %c0_35] : memref<720x48xf32, #tpu.memory_space<vmem>>, vector<192x48xf32>
    %cst_36 = arith.constant dense<0.000000e+00> : vector<192x128xf32>
    %107 = tpu.matmul %106, %105, %cst_36 {dimension_numbers = #tpu.dot_dimension_numbers<[1], [0], [0], [1], [0, 0, 1, 1], [], []>} : vector<192x48xf32>, vector<48x128xf32>, vector<192x128xf32> -> vector<192x128xf32>
    %108 = vector.extract_strided_slice %1 {offsets = [0, 8], sizes = [192, 1], strides = [1, 1]} : vector<192x16xf32> to vector<192x1xf32>
    %109 = vector.broadcast %108 : vector<192x1xf32> to vector<192x128xf32>
    %110 = arith.addf %107, %109 : vector<192x128xf32>
    %cst_37 = arith.constant 0.000000e+00 : f32
    %111 = vector.broadcast %cst_37 : f32 to vector<192x128xf32>
    %112 = arith.maximumf %110, %111 : vector<192x128xf32>
    %c48_38 = arith.constant 48 : index
    %c0_39 = arith.constant 0 : index
    %113 = vector.load %arg3[%c48_38, %c0_39] : memref<96x192xf32, #tpu.memory_space<vmem>>, vector<48x192xf32>
    %cst_40 = arith.constant dense<0.000000e+00> : vector<48x128xf32>
    %114 = tpu.matmul %113, %112, %cst_40 {dimension_numbers = #tpu.dot_dimension_numbers<[1], [0], [0], [1], [0, 0, 1, 1], [], []>} : vector<48x192xf32>, vector<192x128xf32>, vector<48x128xf32> -> vector<48x128xf32>
    %115 = vector.extract_strided_slice %1 {offsets = [0, 9], sizes = [48, 1], strides = [1, 1]} : vector<192x16xf32> to vector<48x1xf32>
    %116 = vector.broadcast %115 : vector<48x1xf32> to vector<48x128xf32>
    %117 = arith.addf %114, %116 : vector<48x128xf32>
    %118 = arith.addf %0, %117 : vector<48x128xf32>
    %cst_41 = arith.constant dense<0.000000e+00> : vector<128xf32>
    %119 = vector.multi_reduction <add>, %118, %cst_41 [0] : vector<48x128xf32> to vector<128xf32>
    %120 = vector.shape_cast %119 : vector<128xf32> to vector<1x128xf32>
    %cst_42 = arith.constant 4.800000e+01 : f32
    %121 = vector.broadcast %cst_42 : f32 to vector<1x128xf32>
    %122 = arith.divf %120, %121 : vector<1x128xf32>
    %123 = vector.broadcast %122 : vector<1x128xf32> to vector<48x128xf32>
    %124 = arith.subf %118, %123 : vector<48x128xf32>
    %125 = arith.mulf %124, %124 : vector<48x128xf32>
    %cst_43 = arith.constant dense<0.000000e+00> : vector<128xf32>
    %126 = vector.multi_reduction <add>, %125, %cst_43 [0] : vector<48x128xf32> to vector<128xf32>
    %127 = vector.shape_cast %126 : vector<128xf32> to vector<1x128xf32>
    %cst_44 = arith.constant 4.800000e+01 : f32
    %128 = vector.broadcast %cst_44 : f32 to vector<1x128xf32>
    %129 = arith.divf %127, %128 : vector<1x128xf32>
    %130 = vector.broadcast %122 : vector<1x128xf32> to vector<48x128xf32>
    %131 = arith.subf %118, %130 : vector<48x128xf32>
    %cst_45 = arith.constant 9.99999974E-6 : f32
    %132 = vector.broadcast %cst_45 : f32 to vector<1x128xf32>
    %133 = arith.addf %129, %132 : vector<1x128xf32>
    %134 = math.rsqrt %133 : vector<1x128xf32>
    %135 = vector.broadcast %134 : vector<1x128xf32> to vector<48x128xf32>
    %136 = arith.mulf %131, %135 : vector<48x128xf32>
    %137 = vector.extract_strided_slice %1 {offsets = [0, 10], sizes = [48, 1], strides = [1, 1]} : vector<192x16xf32> to vector<48x1xf32>
    %138 = vector.broadcast %137 : vector<48x1xf32> to vector<48x128xf32>
    %139 = arith.mulf %136, %138 : vector<48x128xf32>
    %140 = vector.extract_strided_slice %1 {offsets = [0, 11], sizes = [48, 1], strides = [1, 1]} : vector<192x16xf32> to vector<48x1xf32>
    %141 = vector.broadcast %140 : vector<48x1xf32> to vector<48x128xf32>
    %142 = arith.addf %139, %141 : vector<48x128xf32>
    %c0_46 = arith.constant 0 : index
    %c0_47 = arith.constant 0 : index
    %143 = vector.load %arg8[%c0_46, %c0_47] : memref<48x128xf32, #tpu.memory_space<vmem>>, vector<48x128xf32>
    tpu.vector_store %arg8[%c0_46, %c0_47], %142 {strides = array<i32>} : memref<48x128xf32, #tpu.memory_space<vmem>>, vector<48x128xf32>,
    return
  }
  func.func @transform_0(%arg0: i32) -> (i32, i32) {
    %c0_i32 = arith.constant 0 : i32
    %c0_i32_0 = arith.constant 0 : i32
    return %c0_i32, %arg0 : i32, i32
  }
  func.func @transform_1(%arg0: i32) -> (i32, i32) {
    %c0_i32 = arith.constant 0 : i32
    %c0_i32_0 = arith.constant 0 : i32
    %c0_i32_1 = arith.constant 0 : i32
    return %c0_i32, %c0_i32_0 : i32, i32
  }
  func.func @transform_2(%arg0: i32) -> (i32, i32) {
    %c0_i32 = arith.constant 0 : i32
    %c0_i32_0 = arith.constant 0 : i32
    %c0_i32_1 = arith.constant 0 : i32
    return %c0_i32, %c0_i32_0 : i32, i32
  }
  func.func @transform_3(%arg0: i32) -> (i32, i32) {
    %c0_i32 = arith.constant 0 : i32
    %c0_i32_0 = arith.constant 0 : i32
    %c0_i32_1 = arith.constant 0 : i32
    return %c0_i32, %c0_i32_0 : i32, i32
  }
  func.func @transform_4(%arg0: i32) -> (i32, i32) {
    %c0_i32 = arith.constant 0 : i32
    %c0_i32_0 = arith.constant 0 : i32
    %c0_i32_1 = arith.constant 0 : i32
    return %c0_i32, %c0_i32_0 : i32, i32
  }
  func.func @transform_5(%arg0: i32) -> (i32, i32) {
    %c0_i32 = arith.constant 0 : i32
    %c0_i32_0 = arith.constant 0 : i32
    %c0_i32_1 = arith.constant 0 : i32
    return %c0_i32, %c0_i32_0 : i32, i32
  }
  func.func @transform_6(%arg0: i32) -> (i32, i32) {
    %c0_i32 = arith.constant 0 : i32
    %c0_i32_0 = arith.constant 0 : i32
    %c0_i32_1 = arith.constant 0 : i32
    return %c0_i32, %c0_i32_0 : i32, i32
  }
  func.func @transform_7(%arg0: i32) -> (i32, i32) {
    %c0_i32 = arith.constant 0 : i32
    %c0_i32_0 = arith.constant 0 : i32
    return %c0_i32, %arg0 : i32, i32
  }
}

</mosaic_0001>

<bundles_post_ra>
// kernel: tpu_custom_call.1
= control target key start
LH: loop header
LB: loop body
LE: loop exit
PB: predicated region body
PF: predicated region fallthrough
CT: control target
= control target key end

     0   :  { %s4013_s0 = inlined_call_operand.vmem [shape: f32[48,128], index: 0, kind: input, shape index: {}]   ;;  %s4014_s1 = inlined_call_operand.vmem [shape: f32[720,48], index: 1, kind: input, shape index: {}]   ;;  %s4015_s2 = inlined_call_operand.vmem [shape: f32[96,192], index: 2, kind: input, shape index: {}]   ;;  %s4016_s3 = inlined_call_operand.vmem [shape: f32[24,144], index: 3, kind: input, shape index: {}]   ;;  %s4017_s4 = inlined_call_operand.vmem [shape: f32[144,24], index: 4, kind: input, shape index: {}]   ;;  %s4018_s5 = inlined_call_operand.vmem [shape: f32[192,16], index: 5, kind: input, shape index: {}]   ;;  %s4019_s6 = inlined_call_operand.vmem [shape: f32[24,128], index: 6, kind: input, shape index: {}]   ;;  %s4020_s7 = inlined_call_operand.hbm [shape: f32[48,128], index: 7, kind: output, shape index: {}]  }
   0x1   :  { %v32_v0 = vld [vmem:[%s4013_s0 + $0x28] sm:$0xff]  ;;  %v31_v1 = vld [vmem:[%s4013_s0 + $0x20] sm:$0xff]  ;;  %v30_v2 = vld [vmem:[%s4013_s0 + $0x18] sm:$0xff] }
   0x2   :  { %98 = vmatpush.msra.mxu0 %v32_v0 }
   0x4   :  { %99 = vmatpush.msra.mxu0 %v31_v1 }
   0x5   :  { %12 = vsyncpa [#allocation3], 0  ;;  %v29_v3 = vld [vmem:[%s4013_s0 + $0x10] sm:$0xff]  ;;  %v28_v4 = vld [vmem:[%s4013_s0 + $0x8] sm:$0xff]  ;;  %vm69_vm0 = vcmask 392192   ;;  %v2591_v15 = vmov 0  }
   0x6   :  { %100 = vmatpush.msra.mxu0 %v30_v2  ;;  %v27_v5 = vld [vmem:[%s4013_s0] sm:$0xff]  ;;  %v64_v7 = vld [vmem:[%s4014_s1 + $0x8] sm:$0xff]  ;;  %v65_v8 = vld [vmem:[%s4014_s1 + $0x10] sm:$0xff]  ;;  %2460 = vset.pattern.permute.xlu0 %v2591_v15  ;;  %s2592_s12 = smov 127   ;;  %s2593_s17 = smov 1   ;;  %vm428_vm1 = vcmask 130048  }
   0x7   :  { %v63_v6 = vld [vmem:[%s4014_s1] sm:$0xff]  ;;  %v66_v9 = vld [vmem:[%s4014_s1 + $0x18] sm:$0xff]  ;;  %v68_v11 = vld [vmem:[%s4014_s1 + $0x28] sm:$0xff]  ;;  %2461 = vset.pattern.permute.xlu1 %v2591_v15  ;;  %2462 = vset.pattern.permute.xlu2 %v2591_v15  ;;  %vm534_vm2 = vcmask 195584   ;;  %s2281_s27 = sshll.u32 %s4020_s7, 4  ;;  %s2607_s28 = smov 128   ;;  %s2282_s27 = int_to_ptr.hbm [resolvable:$true] %s2281_s27 }
   0x8   :  { %101 = vmatpush.msra.mxu0 %v29_v3  ;;  %v67_v10 = vld [vmem:[%s4014_s1 + $0x20] sm:$0xff]  ;;  %v2698_v14 = vld [vmem:[%s4018_s5 + $0x48] sm:$0xff]  ;;  %v2714_v19 = vld [vmem:[%s4018_s5 + $0x38] sm:$0xff]  ;;  %s2608_s29 = smov 8  }
   0x9   :  { %4025 = vst [vmem:[#allocation5_spill] sm:$0xff] %v2698_v14  ;;  %188 = vperm.xlu0 %2460, %v2698_v14   ;;  %v2706_v17 = vld [vmem:[%s4018_s5 + $0x40] sm:$0xff]  ;;  %v2719_v20 = vld [vmem:[%s4018_s5 + $0x18] sm:$0xff]  ;;  %178 = vperm.xlu1 %2461, %v2714_v19   ;;  %v2733_v23 = vld [vmem:[%s4018_s5 + $0x30] sm:$0xff] }
   0xa   :  { %102 = vmatpush.msra.mxu0 %v28_v4  ;;  %4026 = vst [vmem:[#allocation6_spill] sm:$0xff] %v2706_v17  ;;  %v2728_v22 = vld [vmem:[%s4018_s5 + $0x58] sm:$0xff]  ;;  %v2738_v24 = vld [vmem:[%s4018_s5 + $0x8] sm:$0xff]  ;;  %v2750_v26 = vld [vmem:[%s4018_s5 + $0x50] sm:$0xff] }
   0xb   :  { %4027 = vst [vmem:[#allocation7_spill] sm:$0xff] %v2714_v19  ;;  %198 = vperm.xlu2 %2462, %v2728_v22   ;;  %v2755_v27 = vld [vmem:[%s4018_s5 + $0x10] sm:$0xff]  ;;  %v2770_v29 = vld [vmem:[%s4018_s5] sm:$0xff]  ;;  %v124_v30 = vld [vmem:[%s4014_s1 + $0x38] sm:$0xff] }
   0xc   :  { %103 = vmatpush.msra.mxu0 %v27_v5  ;;  %4028 = vst [vmem:[#allocation8_spill] sm:$0xff] %v2733_v23  ;;  %v123_v28 = vld [vmem:[%s4014_s1 + $0x30] sm:$0xff]  ;;  %v125_v31 = vld [vmem:[%s4014_s1 + $0x40] sm:$0xff]  ;;  %v126_v32 = vld [vmem:[%s4014_s1 + $0x48] sm:$0xff] }
   0xd   :  { %2293 = vmatmul.msk.f32.vlgmr.msra.gmra.mxu0 %vm69_vm0, %v63_v6  ;;  %v127_v33 = vld [vmem:[%s4014_s1 + $0x50] sm:$0xff]  ;;  %v128_v34 = vld [vmem:[%s4014_s1 + $0x58] sm:$0xff]  ;;  %v129_v35 = vld [vmem:[%s4014_s1 + $0x60] sm:$0xff] }
   0xe   :  { %v130_v36 = vld [vmem:[%s4014_s1 + $0x68] sm:$0xff]  ;;  %v131_v37 = vld [vmem:[%s4014_s1 + $0x70] sm:$0xff]  ;;  %v132_v38 = vld [vmem:[%s4014_s1 + $0x78] sm:$0xff] }
   0xf   :  { %v133_v39 = vld [vmem:[%s4014_s1 + $0x80] sm:$0xff]  ;;  %v134_v40 = vld [vmem:[%s4014_s1 + $0x88] sm:$0xff]  ;;  %v135_v43 = vld [vmem:[%s4014_s1 + $0x90] sm:$0xff] }
  0x10   :  { %v136_v45 = vld [vmem:[%s4014_s1 + $0x98] sm:$0xff]  ;;  %v137_v47 = vld [vmem:[%s4014_s1 + $0xa0] sm:$0xff]  ;;  %v138_v49 = vld [vmem:[%s4014_s1 + $0xa8] sm:$0xff] }
  0x11   :  { %183 = vperm.xlu0 %2460, %v2706_v17   ;;  %173 = vperm.xlu1 %2461, %v2733_v23   ;;  %v139_v52 = vld [vmem:[%s4014_s1 + $0xb0] sm:$0xff]  ;;  %v140_v56 = vld [vmem:[%s4014_s1 + $0xb8] sm:$0xff]  ;;  %v2860_v60 = vld [vmem:[%s4018_s5 + $0x20] sm:$0xff] }
  0x12   :  { %v2870_v63 = vld [vmem:[%s4018_s5 + $0x28] sm:$0xff]  ;;  %v2908_v15 = vld [vmem:[%s4018_s5 + $0x78] sm:$0xff] }
  0x13   :  { %193 = vperm.xlu2 %2462, %v2750_v26  }
  0x15   :  { %2294 = vmatmul.msk.f32.gmra.mxu0 %vm69_vm0, %v64_v7 }
  0x19   :  { %158 = vperm.xlu0 %2460, %v2719_v20   ;;  %153 = vperm.xlu1 %2461, %v2755_v27  }
  0x1b   :  { %143 = vperm.xlu2 %2462, %v2770_v29  }
  0x1d   :  { %2295 = vmatmul.msk.f32.gmra.mxu0 %vm69_vm0, %v65_v8 }
  0x21   :  { %148 = vperm.xlu0 %2460, %v2738_v24  }
  0x25   :  { %2296 = vmatmul.msk.f32.gmra.mxu0 %vm69_vm0, %v66_v9  ;;  %v50_v9 = vld [vmem:[%s4018_s5 + $0x88] sm:$0xff] }
  0x2d   :  { %2297 = vmatmul.msk.f32.gmra.mxu0 %vm69_vm0, %v67_v10  ;;  %v2896_v10 = vld [vmem:[%s4018_s5 + $0x70] sm:$0xff] }
  0x35   :  { %2298 = vmatmul.msk.f32.gmra.mxu0 %vm69_vm0, %v68_v11  ;;  %v49_v11 = vld [vmem:[%s4018_s5 + $0x80] sm:$0xff] }
  0x65   :  { %v199_v1 = vpop.permute.xlu2 %198 }
  0x6d   :  { %v194_v6 = vpop.permute.xlu2 %193 }
  0x7b   :  { %v189_v53 = vpop.permute.xlu0 %188  ;;  %v179_v54 = vpop.permute.xlu1 %178 }
  0x83   :  { %v184_v58 = vpop.permute.xlu0 %183  ;;  %v174_v2 = vpop.permute.xlu1 %173 }
  0x8a   :  { %v2691_v12 = vpop.f32.mrf.mxu0 }
  0x92   :  { %v2693_v13 = vpop.f32.mrf.mxu0 }
  0x9a   :  { %v2701_v16 = vpop.f32.mrf.mxu0 }
  0xa2   :  { %v2709_v18 = vpop.f32.mrf.mxu0 }
  0xaa   :  { %v2723_v21 = vpop.f32.mrf.mxu0 }
  0xb2   :  { %v2743_v25 = vpop.f32.mrf.mxu0 }
  0xb3   :  { %295 = vmatpush.msra.mxu1 %v2743_v25 }
  0xb5   :  { %296 = vmatpush.msra.mxu1 %v2723_v21 }
  0xb7   :  { %297 = vmatpush.msra.mxu1 %v2709_v18 }
  0xb9   :  { %298 = vmatpush.msra.mxu1 %v2701_v16 }
  0xbb   :  { %299 = vmatpush.msra.mxu1 %v2693_v13 }
  0xbd   :  { %300 = vmatpush.msra.mxu1 %v2691_v12 }
  0xbe   :  { %2299 = vmatmul.msk.f32.vlgmr.msra.gmra.mxu1 %vm69_vm0, %v123_v28  ;;  %v2914_v28 = vld [vmem:[%s4018_s5 + $0x68] sm:$0xff] }
  0xc6   :  { %2300 = vmatmul.msk.f32.gmra.mxu1 %vm69_vm0, %v124_v30  ;;  %v2919_v30 = vld [vmem:[%s4018_s5 + $0x60] sm:$0xff] }
  0xce   :  { %2301 = vmatmul.msk.f32.gmra.mxu1 %vm69_vm0, %v125_v31  ;;  %v144_v31 = vpop.permute.xlu2 %143 }
  0xd6   :  { %2302 = vmatmul.msk.f32.gmra.mxu1 %vm69_vm0, %v126_v32  ;;  %v159_v32 = vpop.permute.xlu0 %158 }
  0xde   :  { %2303 = vmatmul.msk.f32.gmra.mxu1 %vm69_vm0, %v127_v33 }
  0xe6   :  { %2304 = vmatmul.msk.f32.gmra.mxu1 %vm69_vm0, %v128_v34 }
  0xee   :  { %2305 = vmatmul.msk.f32.gmra.mxu1 %vm69_vm0, %v129_v35 }
  0xf6   :  { %2306 = vmatmul.msk.f32.gmra.mxu1 %vm69_vm0, %v130_v36 }
  0xfe   :  { %2307 = vmatmul.msk.f32.gmra.mxu1 %vm69_vm0, %v131_v37  ;;  %v149_v37 = vpop.permute.xlu0 %148 }
 0x106   :  { %2308 = vmatmul.msk.f32.gmra.mxu1 %vm69_vm0, %v132_v38 }
 0x10e   :  { %2309 = vmatmul.msk.f32.gmra.mxu1 %vm69_vm0, %v133_v39  ;;  %v154_v39 = vpop.permute.xlu1 %153 }
 0x116   :  { %2310 = vmatmul.msk.f32.gmra.mxu1 %vm69_vm0, %v134_v40 }
 0x11e   :  { %2311 = vmatmul.msk.f32.gmra.mxu1 %vm69_vm0, %v135_v43 }
 0x126   :  { %2312 = vmatmul.msk.f32.gmra.mxu1 %vm69_vm0, %v136_v45 }
 0x12e   :  { %2313 = vmatmul.msk.f32.gmra.mxu1 %vm69_vm0, %v137_v47 }
 0x136   :  { %2314 = vmatmul.msk.f32.gmra.mxu1 %vm69_vm0, %v138_v49 }
 0x13b   :  { %v2817_v41 = vpop.f32.mrf.mxu1 }
 0x13e   :  { %2315 = vmatmul.msk.f32.gmra.mxu1 %vm69_vm0, %v139_v52 }
 0x143   :  { %v2819_v42 = vpop.f32.mrf.mxu1 }
 0x146   :  { %2316 = vmatmul.msk.f32.gmra.mxu1 %vm69_vm0, %v140_v56 }
 0x14b   :  { %v2824_v44 = vpop.f32.mrf.mxu1 }
 0x14c   :  { %v309_v45 = vadd.f32 %v2824_v44, %v154_v39 }
 0x153   :  { %v2830_v46 = vpop.f32.mrf.mxu1 }
 0x154   :  { %v312_v34 = vadd.f32 %v2830_v46, %v159_v32  ;;  %v2933_v46 = vadd.f32 %v2817_v41, %v144_v31 }
 0x15b   :  { %v2836_v48 = vpop.f32.mrf.mxu1 }
 0x163   :  { %v2842_v50 = vpop.f32.mrf.mxu1 }
 0x16b   :  { %v320_v51 = vpop.f32.mrf.mxu1 }
 0x16c   :  { %v2879_v4 = vadd.f32 %v320_v51, %v174_v2  ;;  %v306_v51 = vadd.f32 %v2819_v42, %v149_v37 }
 0x173   :  { %v323_v55 = vpop.f32.mrf.mxu1 }
 0x174   :  { %v2852_v57 = vadd.f32 %v323_v55, %v179_v54 }
 0x176   :  { %370 = vrot.lane.b32.xlu0 %v2852_v57, %s2592_s12 }
 0x17b   :  { %v326_v59 = vpop.f32.mrf.mxu1 }
 0x17c   :  { %v2862_v61 = vadd.f32 %v326_v59, %v184_v58 }
 0x17e   :  { %372 = vrot.lane.b32.xlu1 %v2862_v61, %s2592_s12  ;;  %163 = vperm.xlu0 %2460, %v2860_v60  }
 0x183   :  { %v329_v62 = vpop.f32.mrf.mxu1 }
 0x184   :  { %v2872_v0 = vadd.f32 %v329_v62, %v189_v53 }
 0x186   :  { %374 = vrot.lane.b32.xlu2 %v2872_v0, %s2592_s12  ;;  %168 = vperm.xlu1 %2461, %v2870_v63   ;;  %v413_v41 = vmul.f32 %v2872_v0, %v312_v34 }
 0x187   :  { %362 = vrot.lane.b32.xlu0 %v2872_v0, %s2593_s17 }
 0x18b   :  { %v332_v3 = vpop.f32.mrf.mxu1 }
 0x18c   :  { %v333_v8 = vadd.f32 %v332_v3, %v194_v6  ;;  %v412_v6 = vmul.f32 %v2862_v61, %v309_v45 }
 0x18e   :  { %368 = vrot.lane.b32.xlu2 %v2879_v4, %s2592_s12 }
 0x193   :  { %v335_v5 = vpop.f32.mrf.mxu1 }
 0x194   :  { %v336_v7 = vadd.f32 %v335_v5, %v199_v1 }
 0x196   :  { %366 = vrot.lane.b32.xlu1 %v336_v7, %s2593_s17  ;;  %378 = vrot.lane.b32.xlu0 %v336_v7, %s2592_s12 }
 0x197   :  { %364 = vrot.lane.b32.xlu2 %v333_v8, %s2593_s17 }
 0x19b   :  { %v2923_v33 = vpop.f32.mrf.mxu1 }
 0x19e   :  { %360 = vrot.lane.b32.xlu1 %v2862_v61, %s2593_s17  ;;  %228 = vperm.xlu0 %2460, %v50_v9   ;;  %v411_v9 = vmul.f32 %v2852_v57, %v306_v51 }
 0x19f   :  { %358 = vrot.lane.b32.xlu2 %v2852_v57, %s2593_s17  ;;  %v423_v57 = vld [vmem:[%s4016_s3 + $0x8] sm:$0xff] }
 0x1a3   :  { %v2926_v38 = vpop.f32.mrf.mxu1 }
 0x1a6   :  { %213 = vperm.xlu0 %2460, %v2896_v10   ;;  %356 = vrot.lane.b32.xlu1 %v2879_v4, %s2593_s17 }
 0x1a7   :  { %376 = vrot.lane.b32.xlu2 %v333_v8, %s2592_s12 }
 0x1ab   :  { %v2929_v49 = vpop.f32.mrf.mxu1 }
 0x1ae   :  { %223 = vperm.xlu1 %2461, %v49_v11  }
 0x1af   :  { %218 = vperm.xlu2 %2462, %v2908_v15  }
 0x1b3   :  { %v347_v1 = vpop.f32.mrf.mxu1 }
 0x1b6   :  { %208 = vperm.xlu1 %2461, %v2914_v28  }
 0x1b7   :  { %203 = vperm.xlu2 %2462, %v2919_v30  }
 0x1bb   :  { %v350_v11 = vpop.f32.mrf.mxu1 }
 0x1c3   :  { %v353_v37 = vpop.f32.mrf.mxu1 }
 0x1e0   :  { %v375_v35 = vpop.permute.xlu2 %374 }
 0x1e1   :  { %v419_v36 = vmul.f32 %v375_v35, %v312_v34 }
 0x1e3   :  { %438 = vmatpush.msrb.mxu1 %v419_v36 }
 0x1e8   :  { %v369_v40 = vpop.permute.xlu2 %368  ;;  %v371_v43 = vpop.permute.xlu0 %370 }
 0x1e9   :  { %v417_v54 = vmul.f32 %v371_v43, %v306_v51  ;;  %v416_v55 = vmul.f32 %v369_v40, %v2933_v46 }
 0x1f0   :  { %v373_v47 = vpop.permute.xlu1 %372  ;;  %v164_v56 = vpop.permute.xlu0 %163 }
 0x1f1   :  { %v418_v52 = vmul.f32 %v373_v47, %v309_v45  ;;  %v365_v53 = vpop.permute.xlu2 %364  ;;  %v315_v44 = vadd.f32 %v2836_v48, %v164_v56  ;;  %v410_v48 = vmul.f32 %v2879_v4, %v2933_v46  ;;  %v427_v4 = vld [vmem:[%s4016_s3 + $0x28] sm:$0xff] }
 0x1f3   :  { %439 = vmatpush.msrb.mxu1 %v418_v52  ;;  %v414_v2 = vmul.f32 %v333_v8, %v315_v44  ;;  %v408_v61 = vmul.f32 %v365_v53, %v315_v44  ;;  %v425_v53 = vld [vmem:[%s4016_s3 + $0x18] sm:$0xff] }
 0x1f5   :  { %440 = vmatpush.msrb.mxu1 %v417_v54 }
 0x1f7   :  { %441 = vmatpush.msrb.mxu1 %v416_v55 }
 0x1f8   :  { %v169_v58 = vpop.permute.xlu1 %168 }
 0x1f9   :  { %v318_v59 = vadd.f32 %v2842_v50, %v169_v58  ;;  %v359_v62 = vpop.permute.xlu2 %358  ;;  %v363_v3 = vpop.permute.xlu0 %362 }
 0x1fa   :  { %v407_v36 = vmul.f32 %v363_v3, %v312_v34  ;;  %v405_v52 = vmul.f32 %v359_v62, %v306_v51  ;;  %v422_v51 = vld [vmem:[%s4016_s3] sm:$0xff] }
 0x1fb   :  { %v415_v42 = vmul.f32 %v336_v7, %v318_v59 }
 0x1fd   :  { %442 = vmatpush.msrb.mxu1 %v415_v42 }
 0x1ff   :  { %443 = vmatpush.msrb.mxu1 %v414_v2 }
 0x201   :  { %v377_v5 = vpop.permute.xlu2 %376  ;;  %444 = vmatpush.msrb.mxu1 %v413_v41 }
 0x202   :  { %v420_v35 = vmul.f32 %v377_v5, %v315_v44 }
 0x203   :  { %445 = vmatpush.msrb.mxu1 %v412_v6 }
 0x205   :  { %446 = vmatpush.msrb.mxu1 %v411_v9 }
 0x207   :  { %447 = vmatpush.msrb.mxu1 %v410_v48  ;;  %v493_v48 = vld [vmem:[%s4019_s6] sm:$0xff] }
 0x208   :  { %v367_v50 = vpop.permute.xlu1 %366  ;;  %v379_v7 = vpop.permute.xlu0 %378 }
 0x209   :  { %v409_v8 = vmul.f32 %v367_v50, %v318_v59  ;;  %v421_v31 = vmul.f32 %v379_v7, %v318_v59  ;;  %v219_v32 = vpop.permute.xlu2 %218  ;;  %v426_v59 = vld [vmem:[%s4016_s3 + $0x20] sm:$0xff] }
 0x20a   :  { %v2943_v0 = vadd.f32 %v347_v1, %v219_v32 }
 0x20b   :  { %478 = vmatpush.msra.mxu2 %v421_v31  ;;  %2434 = vmatpush.msra.mxu3 %v421_v31  ;;  %v495_v31 = vld [vmem:[%s4019_s6 + $0x10] sm:$0xff] }
 0x20c   :  { %386 = vrot.lane.b32.xlu0 %v2943_v0, %s2593_s17  ;;  %448 = vmatpush.msrb.mxu1 %v409_v8 }
 0x20d   :  { %479 = vmatpush.msra.mxu2 %v420_v35  ;;  %2435 = vmatpush.msra.mxu3 %v420_v35 }
 0x20e   :  { %449 = vmatpush.msrb.mxu1 %v408_v61  ;;  %2317 = vmatmul.msk.f32.vlgmr.msra.gmra.mxu2 %vm428_vm1, %v423_v57 }
 0x20f   :  { %2319 = vmatmul.msk.f32.vlgmr.msra.gmra.mxu3 %vm428_vm1, %v427_v4 }
 0x210   :  { %450 = vmatpush.msrb.mxu1 %v407_v36  ;;  %v361_v39 = vpop.permute.xlu1 %360  ;;  %v229_v40 = vpop.permute.xlu0 %228 }
 0x211   :  { %v406_v43 = vmul.f32 %v361_v39, %v309_v45  ;;  %v2955_v47 = vadd.f32 %v353_v37, %v229_v40  ;;  %v204_v56 = vpop.permute.xlu2 %203 }
 0x213   :  { %451 = vmatpush.msrb.mxu1 %v406_v43 }
 0x214   :  { %390 = vrot.lane.b32.xlu0 %v2955_v47, %s2593_s17 }
 0x215   :  { %452 = vmatpush.msrb.mxu1 %v405_v52 }
 0x216   :  { %2318 = vmatmul.msk.f32.gmra.mxu2 %vm428_vm1, %v425_v53 }
 0x218   :  { %v214_v34 = vpop.permute.xlu0 %213  ;;  %v357_v54 = vpop.permute.xlu1 %356 }
 0x219   :  { %v2964_v55 = vadd.f32 %v2929_v49, %v214_v34  ;;  %v404_v45 = vmul.f32 %v357_v54, %v2933_v46  ;;  %v424_v49 = vld [vmem:[%s4016_s3 + $0x10] sm:$0xff]  ;;  %v2980_v46 = vadd.f32 %v2923_v33, %v204_v56 }
 0x21b   :  { %384 = vrot.lane.b32.xlu2 %v2964_v55, %s2593_s17  ;;  %453 = vmatpush.msrb.mxu1 %v404_v45 }
 0x21c   :  { %398 = vrot.lane.b32.xlu0 %v2943_v0, %s2592_s12  ;;  %454 = vmatmul.f32.vlgmr.msrb.gmra.mxu1 %v422_v51 }
 0x220   :  { %v224_v58 = vpop.permute.xlu1 %223 }
 0x221   :  { %v2974_v44 = vadd.f32 %v350_v11, %v224_v58 }
 0x223   :  { %388 = vrot.lane.b32.xlu1 %v2974_v44, %s2593_s17  ;;  %402 = vrot.lane.b32.xlu2 %v2955_v47, %s2592_s12 }
 0x224   :  { %380 = vrot.lane.b32.xlu0 %v2980_v46, %s2593_s17  ;;  %457 = vmatmul.f32.gmra.mxu1 %v424_v49 }
 0x228   :  { %v209_v33 = vpop.permute.xlu1 %208 }
 0x229   :  { %v2996_v62 = vadd.f32 %v2926_v38, %v209_v33  ;;  %v494_v38 = vld [vmem:[%s4019_s6 + $0x8] sm:$0xff]  ;;  %v516_v33 = vld [vmem:[%s4017_s4] sm:$0xff] }
 0x22b   :  { %400 = vrot.lane.b32.xlu1 %v2974_v44, %s2592_s12  ;;  %396 = vrot.lane.b32.xlu2 %v2964_v55, %s2592_s12 }
 0x22c   :  { %460 = vmatmul.f32.gmra.mxu1 %v426_v59 }
 0x233   :  { %382 = vrot.lane.b32.xlu1 %v2996_v62, %s2593_s17  ;;  %392 = vrot.lane.b32.xlu2 %v2980_v46, %s2592_s12 }
 0x23b   :  { %394 = vrot.lane.b32.xlu1 %v2996_v62, %s2592_s12 }
 0x291   :  { %v481_v1 = vpop.f32.mrf.mxu2 }
 0x292   :  { %v487_v9 = vpop.f32.mrf.mxu3 }
 0x299   :  { %v455_v42 = vpop.f32.mrf.mxu1  ;;  %v484_v2 = vpop.f32.mrf.mxu2 }
 0x29a   :  { %v482_v5 = vadd.f32 %v481_v1, %v455_v42  ;;  %v518_v1 = vld [vmem:[%s4017_s4 + $0x10] sm:$0xff]  ;;  %v520_v42 = vld [vmem:[%s4017_s4 + $0x20] sm:$0xff] }
 0x29c   :  { %v490_v11 = vmul.f32 0.35355338, %v482_v5  ;;  %v522_v5 = vld [vmem:[%s4017_s4 + $0x30] sm:$0xff] }
 0x29e   :  { %v496_v32 = vadd.f32 %v493_v48, %v490_v11  ;;  %v526_v11 = vld [vmem:[%s4017_s4 + $0x50] sm:$0xff]  ;;  %v527_v48 = vld [vmem:[%s4017_s4 + $0x58] sm:$0xff] }
 0x2a1   :  { %v458_v41 = vpop.f32.mrf.mxu1 }
 0x2a2   :  { %v485_v3 = vadd.f32 %v484_v2, %v458_v41  ;;  %v517_v2 = vld [vmem:[%s4017_s4 + $0x8] sm:$0xff]  ;;  %v519_v41 = vld [vmem:[%s4017_s4 + $0x18] sm:$0xff] }
 0x2a4   :  { %v491_v6 = vmul.f32 0.35355338, %v485_v3  ;;  %v521_v3 = vld [vmem:[%s4017_s4 + $0x28] sm:$0xff] }
 0x2a6   :  { %v497_v7 = vadd.f32 %v494_v38, %v491_v6  ;;  %v523_v6 = vld [vmem:[%s4017_s4 + $0x38] sm:$0xff]  ;;  %v524_v38 = vld [vmem:[%s4017_s4 + $0x40] sm:$0xff] }
 0x2a8   :  { %v499_v57 = vmax.f32 %v496_v32, %v497_v7 }
 0x2a9   :  { %v461_v50 = vpop.f32.mrf.mxu1 }
 0x2aa   :  { %v488_v8 = vadd.f32 %v487_v9, %v461_v50  ;;  %v525_v9 = vld [vmem:[%s4017_s4 + $0x48] sm:$0xff]  ;;  %v528_v50 = vld [vmem:[%s4017_s4 + $0x60] sm:$0xff] }
 0x2ac   :  { %v492_v35 = vmul.f32 0.35355338, %v488_v8  ;;  %v530_v8 = vld [vmem:[%s4017_s4 + $0x70] sm:$0xff] }
 0x2ae   :  { %v498_v61 = vadd.f32 %v495_v31, %v492_v35  ;;  %v531_v31 = vld [vmem:[%s4017_s4 + $0x78] sm:$0xff]  ;;  %v533_v35 = vld [vmem:[%s4017_s4 + $0x88] sm:$0xff] }
 0x2b0   :  { %v500_v4 = vmax.f32 %v499_v57, %v498_v61 }
 0x2b2   :  { %v501_v36 = vsub.f32 %v496_v32, %v500_v4  ;;  %v504_v37 = vsub.f32 %v497_v7, %v500_v4  ;;  %v507_v39 = vsub.f32 %v498_v61, %v500_v4  ;;  %v529_v7 = vld [vmem:[%s4017_s4 + $0x68] sm:$0xff]  ;;  %v532_v32 = vld [vmem:[%s4017_s4 + $0x80] sm:$0xff] }
 0x2b4   :  { %v502_v40 = vmul.f32 1.442695, %v501_v36  ;;  %v505_v43 = vmul.f32 1.442695, %v504_v37  ;;  %v508_v52 = vmul.f32 1.442695, %v507_v39 }
 0x2b6   :  { %2498 = vpow2.f32 %v502_v40 }
 0x2b7   :  { %2500 = vpow2.f32 %v505_v43 }
 0x2b8   :  { %2502 = vpow2.f32 %v508_v52 }
 0x2bc   :  { %v2499_v53 = vpop.eup %2498 }
 0x2bd   :  { %v2501_v34 = vpop.eup %2500 }
 0x2be   :  { %v510_v54 = vadd.f32 %v2501_v34, %v2499_v53  ;;  %v2503_v45 = vpop.eup %2502 }
 0x2c0   :  { %v511_v51 = vadd.f32 %v2503_v45, %v510_v54 }
 0x2c2   :  { %2504 = vrcp.f32 %v511_v51  ;;  %v387_v51 = vpop.permute.xlu0 %386 }
 0x2c8   :  { %v2505_v56 = vpop.eup %2504 }
 0x2c9   :  { %v515_v58 = vmul.f32 %v2505_v56, %v2503_v45  ;;  %v514_v49 = vmul.f32 %v2505_v56, %v2501_v34  ;;  %v513_v59 = vmul.f32 %v2505_v56, %v2499_v53  ;;  %v389_v34 = vpop.permute.xlu1 %388  ;;  %v385_v45 = vpop.permute.xlu2 %384 }
 0x2cb   :  { %602 = vmatpush.msrb.mxu0 %v515_v58  ;;  %2436 = vmatpush.msrb.mxu2 %v515_v58 }
 0x2cc   :  { %2437 = vmatpush.msrb.mxu3 %v515_v58  ;;  %v2594_v58 = vmov 1  }
 0x2cd   :  { %603 = vmatpush.msrb.mxu0 %v514_v49  ;;  %2438 = vmatpush.msrb.mxu2 %v514_v49 }
 0x2ce   :  { %2439 = vmatpush.msrb.mxu3 %v514_v49  ;;  %2463 = vset.pattern.permute.xlu0 %v2594_v58 }
 0x2cf   :  { %604 = vmatpush.msrb.mxu0 %v513_v59  ;;  %2440 = vmatpush.msrb.mxu2 %v513_v59 }
 0x2d0   :  { %2441 = vmatpush.msrb.mxu3 %v513_v59  ;;  %2320 = vmatmul.msk.f32.vlgmr.msrb.gmra.mxu0 %vm534_vm2, %v516_v33  ;;  %v391_v33 = vpop.permute.xlu0 %390 }
 0x2d1   :  { %2322 = vmatmul.msk.f32.vlgmr.msrb.gmra.mxu2 %vm534_vm2, %v518_v1  ;;  %2324 = vmatmul.msk.f32.vlgmr.msrb.gmra.mxu3 %vm534_vm2, %v520_v42  ;;  %v401_v49 = vpop.permute.xlu1 %400  ;;  %v403_v59 = vpop.permute.xlu2 %402 }
 0x2d2   :  { %2464 = vset.pattern.permute.xlu1 %v2594_v58  ;;  %717 = vperm.xlu0 %2463, %v2870_v63  }
 0x2d3   :  { %713 = vperm.xlu1 %2464, %v2860_v60   ;;  %2465 = vset.pattern.permute.xlu2 %v2594_v58 }
 0x2d4   :  { %709 = vperm.xlu2 %2465, %v2719_v20  }
 0x2d8   :  { %2321 = vmatmul.msk.f32.gmra.mxu0 %vm534_vm2, %v517_v2 }
 0x2d9   :  { %2323 = vmatmul.msk.f32.gmra.mxu2 %vm534_vm2, %v519_v41  ;;  %2325 = vmatmul.msk.f32.gmra.mxu3 %vm534_vm2, %v521_v3  ;;  %v383_v41 = vpop.permute.xlu1 %382 }
 0x2da   :  { %697 = vperm.xlu0 %2463, %v2770_v29  }
 0x2db   :  { %705 = vperm.xlu1 %2464, %v2755_v27  }
 0x2dc   :  { %701 = vperm.xlu2 %2465, %v2738_v24  }
 0x2e1   :  { %2326 = vmatmul.msk.f32.gmra.mxu3 %vm534_vm2, %v522_v5  ;;  %v397_v5 = vpop.permute.xlu2 %396 }
 0x2e9   :  { %2327 = vmatmul.msk.f32.gmra.mxu3 %vm534_vm2, %v523_v6  ;;  %v399_v6 = vpop.permute.xlu0 %398 }
 0x2f1   :  { %2328 = vmatmul.msk.f32.gmra.mxu3 %vm534_vm2, %v524_v38 }
 0x2f9   :  { %2329 = vmatmul.msk.f32.gmra.mxu3 %vm534_vm2, %v525_v9 }
 0x301   :  { %2330 = vmatmul.msk.f32.gmra.mxu3 %vm534_vm2, %v526_v11 }
 0x309   :  { %2331 = vmatmul.msk.f32.gmra.mxu3 %vm534_vm2, %v527_v48 }
 0x311   :  { %2332 = vmatmul.msk.f32.gmra.mxu3 %vm534_vm2, %v528_v50 }
 0x319   :  { %2333 = vmatmul.msk.f32.gmra.mxu3 %vm534_vm2, %v529_v7 }
 0x321   :  { %2334 = vmatmul.msk.f32.gmra.mxu3 %vm534_vm2, %v530_v8 }
 0x329   :  { %2335 = vmatmul.msk.f32.gmra.mxu3 %vm534_vm2, %v531_v31 }
 0x331   :  { %2336 = vmatmul.msk.f32.gmra.mxu3 %vm534_vm2, %v532_v32 }
 0x339   :  { %2337 = vmatmul.msk.f32.gmra.mxu3 %vm534_vm2, %v533_v35 }
 0x34d   :  { %v606_v2 = vpop.f32.mrf.mxu0 }
 0x354   :  { %v618_v57 = vpop.f32.mrf.mxu3  ;;  %v612_v1 = vpop.f32.mrf.mxu2 }
 0x355   :  { %v664_v48 = vmul.f32 %v618_v57, %v389_v34  ;;  %v609_v58 = vpop.f32.mrf.mxu0  ;;  %v395_v57 = vpop.permute.xlu1 %394 }
 0x35c   :  { %v621_v61 = vpop.f32.mrf.mxu3  ;;  %v615_v38 = vpop.f32.mrf.mxu2 }
 0x35d   :  { %v665_v9 = vmul.f32 %v621_v61, %v391_v33  ;;  %v663_v35 = vmul.f32 %v615_v38, %v387_v51 }
 0x364   :  { %v624_v4 = vpop.f32.mrf.mxu3 }
 0x36c   :  { %v627_v36 = vpop.f32.mrf.mxu3 }
 0x36d   :  { %v667_v14 = vmul.f32 %v627_v36, %v2996_v62 }
 0x374   :  { %v630_v37 = vpop.f32.mrf.mxu3 }
 0x375   :  { %v668_v23 = vmul.f32 %v630_v37, %v2964_v55  ;;  %v381_v55 = vpop.permute.xlu0 %380 }
 0x376   :  { %v660_v37 = vmul.f32 %v606_v2, %v381_v55  ;;  %v714_v2 = vpop.permute.xlu1 %713 }
 0x37c   :  { %v633_v39 = vpop.f32.mrf.mxu3 }
 0x37d   :  { %v669_v7 = vmul.f32 %v633_v39, %v2943_v0  ;;  %v666_v0 = vmul.f32 %v624_v4, %v2980_v46  ;;  %v690_v46 = vld [vmem:[%s4014_s1 + $0xc0] sm:$0xff] }
 0x37e   :  { %v694_v4 = vld [vmem:[%s4014_s1 + $0xe0] sm:$0xff] }
 0x37f   :  { %v675_v61 = vadd.f32 %v669_v7, %v663_v35  ;;  %v672_v62 = vadd.f32 %v666_v0, %v660_v37 }
 0x384   :  { %v636_v40 = vpop.f32.mrf.mxu3 }
 0x385   :  { %v670_v11 = vmul.f32 %v636_v40, %v2974_v44  ;;  %v661_v40 = vmul.f32 %v609_v58, %v383_v41 }
 0x387   :  { %v676_v17 = vadd.f32 %v670_v11, %v664_v48  ;;  %v706_v11 = vpop.permute.xlu1 %705 }
 0x38c   :  { %v639_v43 = vpop.f32.mrf.mxu3 }
 0x38d   :  { %v671_v3 = vmul.f32 %v639_v43, %v2955_v47  ;;  %v662_v43 = vmul.f32 %v612_v1, %v385_v45 }
 0x38f   :  { %v677_v8 = vadd.f32 %v671_v3, %v665_v9  ;;  %v674_v39 = vadd.f32 %v668_v23, %v662_v43  ;;  %v693_v23 = vld [vmem:[%s4014_s1 + $0xd8] sm:$0xff] }
 0x394   :  { %v642_v52 = vpop.f32.mrf.mxu3 }
 0x39c   :  { %v645_v53 = vpop.f32.mrf.mxu3 }
 0x39d   :  { %v679_v34 = vmul.f32 %v645_v53, %v395_v57 }
 0x3a4   :  { %v648_v54 = vpop.f32.mrf.mxu3 }
 0x3a5   :  { %v680_v33 = vmul.f32 %v648_v54, %v397_v5  ;;  %v718_v5 = vpop.permute.xlu0 %717 }
 0x3a7   :  { %v686_v45 = vadd.f32 %v680_v33, %v674_v39 }
 0x3ac   :  { %v651_v56 = vpop.f32.mrf.mxu3 }
 0x3ad   :  { %v681_v19 = vmul.f32 %v651_v56, %v399_v6  ;;  %v673_v56 = vadd.f32 %v667_v14, %v661_v40  ;;  %v692_v14 = vld [vmem:[%s4014_s1 + $0xd0] sm:$0xff] }
 0x3af   :  { %v687_v51 = vadd.f32 %v681_v19, %v675_v61  ;;  %v685_v36 = vadd.f32 %v679_v34, %v673_v56  ;;  %v691_v19 = vld [vmem:[%s4014_s1 + $0xc8] sm:$0xff]  ;;  %v2595_v34 = vmov 2  }
 0x3b0   :  { %2466 = vset.pattern.permute.xlu1 %v2595_v34  ;;  %2467 = vset.pattern.permute.xlu2 %v2595_v34 }
 0x3b1   :  { %966 = vperm.xlu1 %2466, %v2870_v63   ;;  %962 = vperm.xlu2 %2467, %v2860_v60  }
 0x3b4   :  { %v654_v42 = vpop.f32.mrf.mxu3 }
 0x3b5   :  { %v682_v31 = vmul.f32 %v654_v42, %v401_v49  ;;  %v393_v49 = vpop.permute.xlu2 %392 }
 0x3b7   :  { %v688_v44 = vadd.f32 %v682_v31, %v676_v17 }
 0x3b9   :  { %958 = vperm.xlu1 %2466, %v2719_v20  }
 0x3bc   :  { %v657_v50 = vpop.f32.mrf.mxu3 }
 0x3bd   :  { %v683_v32 = vmul.f32 %v657_v50, %v403_v59  ;;  %v678_v59 = vmul.f32 %v642_v52, %v393_v49  ;;  %v695_v52 = vld [vmem:[%s4014_s1 + $0xe8] sm:$0xff]  ;;  %v710_v3 = vpop.permute.xlu2 %709 }
 0x3bf   :  { %v689_v47 = vadd.f32 %v683_v32, %v677_v8  ;;  %v684_v17 = vadd.f32 %v678_v59, %v672_v62  ;;  %v698_v32 = vpop.permute.xlu0 %697 }
 0x3c1   :  { %748 = vmatpush.msra.mxu2 %v689_v47  ;;  %954 = vperm.xlu1 %2466, %v2755_v27  }
 0x3c3   :  { %749 = vmatpush.msra.mxu2 %v688_v44 }
 0x3c5   :  { %750 = vmatpush.msra.mxu2 %v687_v51  ;;  %v702_v7 = vpop.permute.xlu2 %701 }
 0x3c7   :  { %751 = vmatpush.msra.mxu2 %v686_v45 }
 0x3c9   :  { %752 = vmatpush.msra.mxu2 %v685_v36 }
 0x3cb   :  { %753 = vmatpush.msra.mxu2 %v684_v17 }
 0x3cc   :  { %2338 = vmatmul.msk.f32.vlgmr.msra.gmra.mxu2 %vm69_vm0, %v690_v46 }
 0x3d4   :  { %2339 = vmatmul.msk.f32.gmra.mxu2 %vm69_vm0, %v691_v19 }
 0x3dc   :  { %2340 = vmatmul.msk.f32.gmra.mxu2 %vm69_vm0, %v692_v14 }
 0x3e4   :  { %2341 = vmatmul.msk.f32.gmra.mxu2 %vm69_vm0, %v693_v23  ;;  %v2596_v23 = vmov 3  }
 0x3e5   :  { %2468 = vset.pattern.permute.xlu0 %v2596_v23  ;;  %2469 = vset.pattern.permute.xlu2 %v2596_v23 }
 0x3e6   :  { %996 = vperm.xlu0 %2468, %v2870_v63   ;;  %992 = vperm.xlu2 %2469, %v2860_v60  }
 0x3e7   :  { %2471 = vset.pattern.permute.xlu1 %v2596_v23 }
 0x3e8   :  { %984 = vperm.xlu1 %2471, %v2755_v27   ;;  %v2597_v27 = vmov 4  }
 0x3ec   :  { %2342 = vmatmul.msk.f32.gmra.mxu2 %vm69_vm0, %v694_v4 }
 0x3ee   :  { %2470 = vset.pattern.permute.xlu0 %v2595_v34  ;;  %988 = vperm.xlu2 %2469, %v2719_v20  }
 0x3ef   :  { %950 = vperm.xlu0 %2470, %v2738_v24  }
 0x3f0   :  { %980 = vperm.xlu1 %2471, %v2738_v24  }
 0x3f4   :  { %2343 = vmatmul.msk.f32.gmra.mxu2 %vm69_vm0, %v695_v52 }
 0x3f6   :  { %2472 = vset.pattern.permute.xlu2 %v2595_v34 }
 0x3f7   :  { %946 = vperm.xlu2 %2472, %v2770_v29   ;;  %2474 = vset.pattern.permute.xlu0 %v2597_v27 }
 0x3f8   :  { %2475 = vset.pattern.permute.xlu1 %v2597_v27  ;;  %1090 = vperm.xlu0 %2474, %v2908_v15   ;;  %v4031_v15 = vld [vmem:[#allocation6_spill] sm:$0xff] }
 0x3f9   :  { %1086 = vperm.xlu1 %2475, %v2896_v10  }
 0x3ff   :  { %2473 = vset.pattern.permute.xlu2 %v2596_v23 }
 0x400   :  { %976 = vperm.xlu2 %2473, %v2770_v29   ;;  %1070 = vperm.xlu0 %2474, %v2750_v26  }
 0x401   :  { %1078 = vperm.xlu1 %2475, %v2919_v30  }
 0x408   :  { %2476 = vset.pattern.permute.xlu2 %v2597_v27 }
 0x409   :  { %1082 = vperm.xlu2 %2476, %v2914_v28  }
 0x411   :  { %1074 = vperm.xlu2 %2476, %v2728_v22   ;;  %v3238_v22 = vpop.permute.xlu2 %962 }
 0x419   :  { %1062 = vperm.xlu2 %2476, %v4031_v15  }
 0x421   :  { %1050 = vperm.xlu2 %2476, %v2870_v63  }
 0x423   :  { %v3233_v28 = vpop.permute.xlu1 %966 }
 0x44f   :  { %v755_v53 = vpop.f32.mrf.mxu2 }
 0x450   :  { %v756_v47 = vadd.f32 %v755_v53, %v698_v32  ;;  %v4029_v53 = vld [vmem:[#allocation5_spill] sm:$0xff] }
 0x451   :  { %1066 = vperm.xlu1 %2475, %v4029_v53   ;;  %v1018_v53 = vld [vmem:[%s4014_s1 + $0x158] sm:$0xff] }
 0x452   :  { %v773_v33 = vadd.f32 %v756_v47, %v2691_v12  ;;  %v3144_v12 = vld [vmem:[%s4014_s1 + $0x2b0] sm:$0xff] }
 0x457   :  { %v758_v54 = vpop.f32.mrf.mxu2 }
 0x458   :  { %v759_v35 = vadd.f32 %v758_v54, %v702_v7  ;;  %v4030_v54 = vld [vmem:[#allocation7_spill] sm:$0xff]  ;;  %v3264_v7 = vld [vmem:[%s4018_s5 + $0x18] sm:$0xff] }
 0x459   :  { %1058 = vperm.xlu0 %2474, %v4030_v54   ;;  %v997_v54 = vpop.permute.xlu0 %996 }
 0x45a   :  { %v774_v61 = vadd.f32 %v759_v35, %v2693_v13  ;;  %v3151_v13 = vld [vmem:[%s4014_s1 + $0x2b8] sm:$0xff] }
 0x45f   :  { %v761_v1 = vpop.f32.mrf.mxu2 }
 0x460   :  { %v762_v8 = vadd.f32 %v761_v1, %v706_v11 }
 0x461   :  { %1046 = vperm.xlu0 %2474, %v2860_v60  }
 0x462   :  { %v775_v43 = vadd.f32 %v762_v8, %v2701_v16  ;;  %v3137_v16 = vld [vmem:[%s4014_s1 + $0x2a8] sm:$0xff]  ;;  %v3270_v8 = vld [vmem:[%s4018_s5 + $0x10] sm:$0xff] }
 0x467   :  { %v764_v42 = vpop.f32.mrf.mxu2 }
 0x468   :  { %v765_v48 = vadd.f32 %v764_v42, %v710_v3 }
 0x469   :  { %1038 = vperm.xlu0 %2474, %v3270_v8  }
 0x46a   :  { %v776_v58 = vadd.f32 %v765_v48, %v2709_v18  ;;  %v3158_v18 = vld [vmem:[%s4014_s1 + $0x2c0] sm:$0xff] }
 0x46f   :  { %v767_v41 = vpop.f32.mrf.mxu2 }
 0x470   :  { %v768_v38 = vadd.f32 %v767_v41, %v714_v2  ;;  %v4032_v2 = vld [vmem:[#allocation8_spill] sm:$0xff] }
 0x471   :  { %1054 = vperm.xlu1 %2475, %v4032_v2  }
 0x472   :  { %v777_v31 = vadd.f32 %v768_v38, %v2723_v21  ;;  %v3130_v21 = vld [vmem:[%s4014_s1 + $0x2a0] sm:$0xff] }
 0x477   :  { %v770_v6 = vpop.f32.mrf.mxu2 }
 0x478   :  { %v771_v9 = vadd.f32 %v770_v6, %v718_v5 }
 0x479   :  { %1042 = vperm.xlu1 %2475, %v3264_v7  }
 0x47a   :  { %v778_v50 = vadd.f32 %v771_v9, %v2743_v25  ;;  %v3165_v25 = vld [vmem:[%s4014_s1 + $0x2c8] sm:$0xff]  ;;  %v3255_v9 = vpop.permute.xlu1 %958 }
 0x47c   :  { %807 = vmatpush.msra.mxu0 %v778_v50 }
 0x47e   :  { %808 = vmatpush.msra.mxu0 %v777_v31 }
 0x480   :  { %809 = vmatpush.msra.mxu0 %v776_v58 }
 0x482   :  { %810 = vmatpush.msra.mxu0 %v775_v43 }
 0x484   :  { %811 = vmatpush.msra.mxu0 %v774_v61 }
 0x486   :  { %812 = vmatpush.msra.mxu0 %v773_v33 }
 0x487   :  { %2344 = vmatmul.msk.f32.vlgmr.msra.gmra.mxu0 %vm69_vm0, %v3130_v21 }
 0x48f   :  { %2345 = vmatmul.msk.f32.gmra.mxu0 %vm69_vm0, %v3137_v16 }
 0x497   :  { %2346 = vmatmul.msk.f32.gmra.mxu0 %vm69_vm0, %v3144_v12 }
 0x49f   :  { %2347 = vmatmul.msk.f32.gmra.mxu0 %vm69_vm0, %v3151_v13 }
 0x4a7   :  { %2348 = vmatmul.msk.f32.gmra.mxu0 %vm69_vm0, %v3158_v18 }
 0x4af   :  { %2349 = vmatmul.msk.f32.gmra.mxu0 %vm69_vm0, %v3165_v25 }
 0x504   :  { %v814_v44 = vpop.f32.mrf.mxu0 }
 0x505   :  { %v3188_v17 = vsub.f32 %v773_v33, %v814_v44 }
 0x507   :  { %v838_v14 = vmul.f32 %v3188_v17, %v3188_v17 }
 0x50c   :  { %v817_v57 = vpop.f32.mrf.mxu0 }
 0x50d   :  { %v3184_v62 = vsub.f32 %v774_v61, %v817_v57  ;;  %v55_v57 = vld [vmem:[%s4018_s5 + $0xb0] sm:$0xff] }
 0x50e   :  { %1123 = vperm.xlu1 %2475, %v55_v57  }
 0x50f   :  { %v839_v19 = vmul.f32 %v3184_v62, %v3184_v62 }
 0x514   :  { %v820_v40 = vpop.f32.mrf.mxu0 }
 0x515   :  { %v3180_v59 = vsub.f32 %v775_v43, %v820_v40 }
 0x517   :  { %v840_v46 = vmul.f32 %v3180_v59, %v3180_v59 }
 0x51c   :  { %v823_v0 = vpop.f32.mrf.mxu0 }
 0x51d   :  { %v3176_v37 = vsub.f32 %v776_v58, %v823_v0 }
 0x51f   :  { %v841_v36 = vmul.f32 %v3176_v37, %v3176_v37 }
 0x524   :  { %v826_v39 = vpop.f32.mrf.mxu0 }
 0x525   :  { %v3171_v49 = vsub.f32 %v777_v31, %v826_v39  ;;  %v3273_v31 = vpop.permute.xlu2 %992 }
 0x527   :  { %v842_v45 = vmul.f32 %v3171_v49, %v3171_v49 }
 0x52c   :  { %v829_v51 = vpop.f32.mrf.mxu0 }
 0x52d   :  { %v3173_v55 = vsub.f32 %v778_v50, %v829_v51 }
 0x52f   :  { %v843_v56 = vmul.f32 %v3173_v55, %v3173_v55 }
 0x531   :  { %854 = vmatpush.msrb.mxu2 %v843_v56  ;;  %v955_v56 = vpop.permute.xlu1 %954 }
 0x533   :  { %855 = vmatpush.msrb.mxu2 %v842_v45 }
 0x535   :  { %856 = vmatpush.msrb.mxu2 %v841_v36 }
 0x537   :  { %857 = vmatpush.msrb.mxu2 %v840_v46 }
 0x539   :  { %858 = vmatpush.msrb.mxu2 %v839_v19  ;;  %v989_v19 = vpop.permute.xlu2 %988 }
 0x53b   :  { %859 = vmatpush.msrb.mxu2 %v838_v14 }
 0x53c   :  { %2350 = vmatmul.msk.f32.vlgmr.msrb.gmra.mxu2 %vm69_vm0, %v3130_v21 }
 0x544   :  { %2351 = vmatmul.msk.f32.gmra.mxu2 %vm69_vm0, %v3137_v16 }
 0x54c   :  { %2352 = vmatmul.msk.f32.gmra.mxu2 %vm69_vm0, %v3144_v12 }
 0x554   :  { %2353 = vmatmul.msk.f32.gmra.mxu2 %vm69_vm0, %v3151_v13 }
 0x55c   :  { %2354 = vmatmul.msk.f32.gmra.mxu2 %vm69_vm0, %v3158_v18 }
 0x564   :  { %2355 = vmatmul.msk.f32.gmra.mxu2 %vm69_vm0, %v3165_v25 }
 0x5bf   :  { %v861_v20 = vpop.f32.mrf.mxu2 }
 0x5c0   :  { %v3235_v26 = vadd.f32 1e-05, %v861_v20 }
 0x5c7   :  { %v864_v24 = vpop.f32.mrf.mxu2 }
 0x5c8   :  { %v3230_v1 = vadd.f32 1e-05, %v864_v24 }
 0x5ca   :  { %vm895_vm2 = vweird.f32 %v3230_v1 }
 0x5cf   :  { %v867_v4 = vpop.f32.mrf.mxu2 }
 0x5d0   :  { %v3227_v10 = vadd.f32 1e-05, %v867_v4 }
 0x5d2   :  { %vm905_vm10 = vweird.f32 %v3227_v10 }
 0x5d7   :  { %v870_v29 = vpop.f32.mrf.mxu2 }
 0x5d8   :  { %v3223_v52 = vadd.f32 1e-05, %v870_v29 }
 0x5da   :  { %2506 = vrsqrt.f32 %v3223_v52  ;;  %vm915_vm7 = vweird.f32 %v3223_v52 }
 0x5db   :  { %2508 = vrsqrt.f32 %v3227_v10 }
 0x5dc   :  { %2510 = vrsqrt.f32 %v3230_v1 }
 0x5dd   :  { %2512 = vrsqrt.f32 %v3235_v26 }
 0x5df   :  { %v873_v30 = vpop.f32.mrf.mxu2 }
 0x5e0   :  { %v874_v42 = vadd.f32 1e-05, %v873_v30  ;;  %v3244_v41 = vpop.eup %2506 }
 0x5e1   :  { %v3247_v3 = vpop.eup %2508  ;;  %v910_v6 = vmul.f32 %v3244_v41, %v3223_v52  ;;  %vm916_vm4 = vweird.f32 %v3244_v41  ;;  %v3304_v52 = vld [vmem:[%s4018_s5] sm:$0xff] }
 0x5e2   :  { %2514 = vrsqrt.f32 %v874_v42  ;;  %v3249_v5 = vpop.eup %2510  ;;  %v900_v60 = vmul.f32 %v3247_v3, %v3227_v10  ;;  %vm925_vm5 = vweird.f32 %v874_v42  ;;  %vm906_vm6 = vweird.f32 %v3247_v3  ;;  %vm3296_vm11 = vmor %vm915_vm7, %vm916_vm4  ;;  %1030 = vperm.xlu1 %2475, %v3304_v52  }
 0x5e3   :  { %v3253_v38 = vpop.eup %2512  ;;  %v890_v50 = vmul.f32 %v3249_v5, %v3230_v1  ;;  %v911_v32 = vmul.f32 %v3244_v41, %v910_v6  ;;  %vm896_vm12 = vweird.f32 %v3249_v5  ;;  %vm3307_vm13 = vmor %vm905_vm10, %vm906_vm6  ;;  %vm885_vm4 = vweird.f32 %v3235_v26  ;;  %v1021_v6 = vld [vmem:[%s4014_s1 + $0x170] sm:$0xff] }
 0x5e4   :  { %v880_v58 = vmul.f32 %v3253_v38, %v3235_v26  ;;  %v901_v47 = vmul.f32 %v3247_v3, %v900_v60  ;;  %vm886_vm15 = vweird.f32 %v3253_v38  ;;  %vm1352_vm6 = vcmask 523264  }
 0x5e5   :  { %v891_v61 = vmul.f32 %v3249_v5, %v890_v50  ;;  %v912_v33 = vmul.f32 0.5, %v911_v32  ;;  %v985_v32 = vpop.permute.xlu1 %984 }
 0x5e6   :  { %v881_v40 = vmul.f32 %v3253_v38, %v880_v58  ;;  %v902_v0 = vmul.f32 0.5, %v901_v47 }
 0x5e7   :  { %v876_v11 = vpop.f32.mrf.mxu2  ;;  %v892_v51 = vmul.f32 0.5, %v891_v61  ;;  %v913_v45 = vsub.f32 1.5, %v912_v33 }
 0x5e8   :  { %v2515_v48 = vpop.eup %2514  ;;  %v877_v63 = vadd.f32 1e-05, %v876_v11  ;;  %v882_v46 = vmul.f32 0.5, %v881_v40  ;;  %v903_v14 = vsub.f32 1.5, %v902_v0  ;;  %v3361_v0 = vld [vmem:[%s4018_s5 + $0xb8] sm:$0xff] }
 0x5e9   :  { %v920_v35 = vmul.f32 %v2515_v48, %v874_v42  ;;  %vm926_vm3 = vweird.f32 %v2515_v48  ;;  %v893_v24 = vsub.f32 1.5, %v892_v51  ;;  %v914_v27 = vmul.f32 %v3244_v41, %v913_v45  ;;  %1128 = vperm.xlu2 %2476, %v3361_v0   ;;  %v1007_v51 = vld [vmem:[%s4014_s1 + $0x100] sm:$0xff]  ;;  %v1009_v45 = vld [vmem:[%s4014_s1 + $0x110] sm:$0xff] }
 0x5ea   :  { %2516 = vrsqrt.f32 %v877_v63  ;;  %v883_v29 = vsub.f32 1.5, %v882_v46  ;;  %vm3288_vm8 = vmor %vm925_vm5, %vm926_vm3  ;;  %v904_v15 = vmul.f32 %v3247_v3, %v903_v14  ;;  %vm935_vm14 = vweird.f32 %v877_v63  ;;  %v1011_v46 = vld [vmem:[%s4014_s1 + $0x120] sm:$0xff]  ;;  %v1013_v14 = vld [vmem:[%s4014_s1 + $0x130] sm:$0xff] }
 0x5eb   :  { %v921_v43 = vmul.f32 %v2515_v48, %v920_v35  ;;  %v894_v60 = vmul.f32 %v3249_v5, %v893_v24  ;;  %v918_v11 = vsel %vm3296_vm11, %v3244_v41, %v914_v27  ;;  %vm897_vm3 = vmor %vm895_vm2, %vm896_vm12  ;;  %v1016_v24 = vld [vmem:[%s4014_s1 + $0x148] sm:$0xff] }
 0x5ec   :  { %v884_v50 = vmul.f32 %v3253_v38, %v883_v29  ;;  %v908_v35 = vsel %vm3307_vm13, %v3247_v3, %v904_v15  ;;  %vm887_vm5 = vmor %vm885_vm4, %vm886_vm15  ;;  %v3417_v27 = vld [vmem:[%s4018_s5 + $0xa8] sm:$0xff]  ;;  %v3427_v29 = vld [vmem:[%s4018_s5 + $0x98] sm:$0xff] }
 0x5ed   :  { %v922_v44 = vmul.f32 0.5, %v921_v43  ;;  %v898_v1 = vsel %vm897_vm3, %v3249_v5, %v894_v60  ;;  %v941_v47 = vmul.f32 %v908_v35, %v3180_v59  ;;  %v981_v5 = vpop.permute.xlu1 %980  ;;  %1118 = vperm.xlu0 %2474, %v3417_v27   ;;  %v1019_v15 = vld [vmem:[%s4014_s1 + $0x160] sm:$0xff] }
 0x5ee   :  { %v888_v61 = vsel %vm887_vm5, %v3253_v38, %v884_v50  ;;  %v940_v33 = vmul.f32 %v898_v1, %v3184_v62  ;;  %v3463_v60 = vld [vmem:[%s4018_s5 + $0xa0] sm:$0xff]  ;;  %v1026_v1 = vld [vmem:[%s4014_s1 + $0x198] sm:$0xff] }
 0x5ef   :  { %v923_v39 = vsub.f32 1.5, %v922_v44  ;;  %v939_v26 = vmul.f32 %v888_v61, %v3188_v17  ;;  %v971_v57 = vmul.f32 %v955_v56, %v941_v47  ;;  %v1008_v56 = vld [vmem:[%s4014_s1 + $0x108] sm:$0xff] }
 0x5f0   :  { %v2517_v34 = vpop.eup %2516  ;;  %v1028_v61 = vld [vmem:[%s4014_s1 + $0x1a8] sm:$0xff] }
 0x5f1   :  { %v930_v36 = vmul.f32 %v2517_v34, %v877_v63  ;;  %v924_v23 = vmul.f32 %v2515_v48, %v923_v39  ;;  %vm936_vm9 = vweird.f32 %v2517_v34  ;;  %v942_v63 = vmul.f32 %v918_v11, %v3176_v37  ;;  %v951_v37 = vpop.permute.xlu0 %950  ;;  %v1006_v39 = vld [vmem:[%s4014_s1 + $0xf8] sm:$0xff] }
 0x5f2   :  { %vm937_vm1 = vmor %vm935_vm14, %vm936_vm9  ;;  %v3344_v38 = vadd.f32 %v985_v32, %v971_v57  ;;  %v1022_v11 = vld [vmem:[%s4014_s1 + $0x178] sm:$0xff]  ;;  %v1023_v32 = vld [vmem:[%s4014_s1 + $0x180] sm:$0xff] }
 0x5f3   :  { %v931_v20 = vmul.f32 %v2517_v34, %v930_v36  ;;  %v928_v2 = vsel %vm3288_vm8, %v2515_v48, %v924_v23  ;;  %v1010_v36 = vld [vmem:[%s4014_s1 + $0x118] sm:$0xff] }
 0x5f4   :  { %v943_v48 = vmul.f32 %v928_v2, %v3171_v49  ;;  %v947_v49 = vpop.permute.xlu2 %946  ;;  %v1014_v23 = vld [vmem:[%s4014_s1 + $0x138] sm:$0xff]  ;;  %v1020_v2 = vld [vmem:[%s4014_s1 + $0x168] sm:$0xff] }
 0x5f5   :  { %v932_v4 = vmul.f32 0.5, %v931_v20  ;;  %v969_v62 = vmul.f32 %v947_v49, %v939_v26  ;;  %v1015_v20 = vld [vmem:[%s4014_s1 + $0x140] sm:$0xff]  ;;  %1108 = vperm.xlu0 %2474, %v3427_v29   ;;  %v1087_v26 = vpop.permute.xlu1 %1086 }
 0x5f6   :  { %v973_v3 = vmul.f32 %v3238_v22, %v943_v48  ;;  %v3475_v48 = vld [vmem:[%s4018_s5 + $0x88] sm:$0xff] }
 0x5f7   :  { %v933_v30 = vsub.f32 1.5, %v932_v4  ;;  %v1017_v4 = vld [vmem:[%s4014_s1 + $0x150] sm:$0xff] }
 0x5f8   :  { %v3339_v59 = vadd.f32 %v3273_v31, %v973_v3  ;;  %v1005_v31 = vld [vmem:[%s4014_s1 + $0xf0] sm:$0xff] }
 0x5f9   :  { %v934_v10 = vmul.f32 %v2517_v34, %v933_v30  ;;  %v3447_v30 = vld [vmem:[%s4018_s5 + $0x90] sm:$0xff] }
 0x5fa   :  { %1103 = vperm.xlu1 %2475, %v3447_v30  }
 0x5fb   :  { %v938_v58 = vsel %vm937_vm1, %v2517_v34, %v934_v10  ;;  %v3371_v34 = vld [vmem:[%s4018_s5 + $0x8] sm:$0xff] }
 0x5fc   :  { %v944_v41 = vmul.f32 %v938_v58, %v3173_v55  ;;  %v972_v55 = vmul.f32 %v3255_v9, %v942_v63  ;;  %v977_v9 = vpop.permute.xlu2 %976  ;;  %1034 = vperm.xlu2 %2476, %v3371_v34   ;;  %v1024_v58 = vld [vmem:[%s4014_s1 + $0x188] sm:$0xff]  ;;  %v1025_v63 = vld [vmem:[%s4014_s1 + $0x190] sm:$0xff] }
 0x5fd   :  { %v3350_v17 = vadd.f32 %v977_v9, %v969_v62  ;;  %v1091_v9 = vpop.permute.xlu0 %1090 }
 0x5fe   :  { %v974_v43 = vmul.f32 %v3233_v28, %v944_v41  ;;  %v970_v28 = vmul.f32 %v951_v37, %v940_v33  ;;  %v3342_v22 = vadd.f32 %v989_v19, %v972_v55  ;;  %v1012_v19 = vld [vmem:[%s4014_s1 + $0x128] sm:$0xff] }
 0x600   :  { %v3333_v44 = vadd.f32 %v997_v54, %v974_v43  ;;  %v3347_v40 = vadd.f32 %v981_v5, %v970_v28  ;;  %v3437_v54 = vld [vmem:[%s4018_s5 + $0x80] sm:$0xff]  ;;  %v1079_v5 = vpop.permute.xlu1 %1078 }
 0x601   :  { %1094 = vperm.xlu0 %2474, %v3437_v54   ;;  %v1027_v43 = vld [vmem:[%s4014_s1 + $0x1a0] sm:$0xff] }
 0x602   :  { %1213 = vmatpush.msrb.mxu0 %v3333_v44 }
 0x604   :  { %1214 = vmatpush.msrb.mxu0 %v3339_v59  ;;  %1113 = vperm.xlu2 %2476, %v3463_v60   ;;  %v1083_v28 = vpop.permute.xlu2 %1082 }
 0x606   :  { %1215 = vmatpush.msrb.mxu0 %v3342_v22 }
 0x608   :  { %1216 = vmatpush.msrb.mxu0 %v3344_v38 }
 0x60a   :  { %1217 = vmatpush.msrb.mxu0 %v3347_v40 }
 0x60c   :  { %1218 = vmatpush.msrb.mxu0 %v3350_v17  ;;  %1098 = vperm.xlu2 %2476, %v3475_v48  }
 0x60d   :  { %2356 = vmatmul.msk.f32.vlgmr.msrb.gmra.mxu0 %vm69_vm0, %v1005_v31  ;;  %v1075_v31 = vpop.permute.xlu2 %1074 }
 0x615   :  { %2357 = vmatmul.msk.f32.gmra.mxu0 %vm69_vm0, %v1006_v39 }
 0x61d   :  { %2358 = vmatmul.msk.f32.gmra.mxu0 %vm69_vm0, %v1007_v51  ;;  %v1067_v51 = vpop.permute.xlu1 %1066 }
 0x625   :  { %2359 = vmatmul.msk.f32.gmra.mxu0 %vm69_vm0, %v1008_v56  ;;  %v1071_v56 = vpop.permute.xlu0 %1070 }
 0x62d   :  { %2360 = vmatmul.msk.f32.gmra.mxu0 %vm69_vm0, %v1009_v45 }
 0x635   :  { %2361 = vmatmul.msk.f32.gmra.mxu0 %vm69_vm0, %v1010_v36  ;;  %v1063_v36 = vpop.permute.xlu2 %1062 }
 0x63d   :  { %2362 = vmatmul.msk.f32.gmra.mxu0 %vm69_vm0, %v1011_v46  ;;  %v1055_v46 = vpop.permute.xlu1 %1054 }
 0x645   :  { %2363 = vmatmul.msk.f32.gmra.mxu0 %vm69_vm0, %v1012_v19 }
 0x64d   :  { %2364 = vmatmul.msk.f32.gmra.mxu0 %vm69_vm0, %v1013_v14 }
 0x655   :  { %2365 = vmatmul.msk.f32.gmra.mxu0 %vm69_vm0, %v1014_v23 }
 0x65d   :  { %2366 = vmatmul.msk.f32.gmra.mxu0 %vm69_vm0, %v1015_v20  ;;  %v1059_v20 = vpop.permute.xlu0 %1058 }
 0x665   :  { %2367 = vmatmul.msk.f32.gmra.mxu0 %vm69_vm0, %v1016_v24 }
 0x66d   :  { %2368 = vmatmul.msk.f32.gmra.mxu0 %vm69_vm0, %v1017_v4 }
 0x675   :  { %2369 = vmatmul.msk.f32.gmra.mxu0 %vm69_vm0, %v1018_v53  ;;  %v1051_v53 = vpop.permute.xlu2 %1050 }
 0x67d   :  { %2370 = vmatmul.msk.f32.gmra.mxu0 %vm69_vm0, %v1019_v15 }
 0x685   :  { %2371 = vmatmul.msk.f32.gmra.mxu0 %vm69_vm0, %v1020_v2 }
 0x68a   :  { %v3454_v42 = vpop.f32.mrf.mxu0 }
 0x68d   :  { %2372 = vmatmul.msk.f32.gmra.mxu0 %vm69_vm0, %v1021_v6  ;;  %v1043_v6 = vpop.permute.xlu1 %1042 }
 0x692   :  { %v3466_v10 = vpop.f32.mrf.mxu0 }
 0x695   :  { %2373 = vmatmul.msk.f32.gmra.mxu0 %vm69_vm0, %v1022_v11 }
 0x69a   :  { %v3478_v50 = vpop.f32.mrf.mxu0 }
 0x69d   :  { %2374 = vmatmul.msk.f32.gmra.mxu0 %vm69_vm0, %v1023_v32 }
 0x6a2   :  { %v3484_v35 = vpop.f32.mrf.mxu0 }
 0x6a5   :  { %2375 = vmatmul.msk.f32.gmra.mxu0 %vm69_vm0, %v1024_v58 }
 0x6aa   :  { %v3490_v41 = vpop.f32.mrf.mxu0 }
 0x6ad   :  { %2376 = vmatmul.msk.f32.gmra.mxu0 %vm69_vm0, %v1025_v63 }
 0x6b2   :  { %v1235_v49 = vpop.f32.mrf.mxu0 }
 0x6b5   :  { %2377 = vmatmul.msk.f32.gmra.mxu0 %vm69_vm0, %v1026_v1 }
 0x6ba   :  { %v1238_v47 = vpop.f32.mrf.mxu0 }
 0x6bd   :  { %2378 = vmatmul.msk.f32.gmra.mxu0 %vm69_vm0, %v1027_v43 }
 0x6c2   :  { %v1241_v3 = vpop.f32.mrf.mxu0 }
 0x6c5   :  { %2379 = vmatmul.msk.f32.gmra.mxu0 %vm69_vm0, %v1028_v61 }
 0x6ca   :  { %v1244_v33 = vpop.f32.mrf.mxu0 }
 0x6d2   :  { %v1247_v55 = vpop.f32.mrf.mxu0 }
 0x6d3   :  { %v1248_v43 = vadd.f32 %v1247_v55, %v1067_v51 }
 0x6da   :  { %v1250_v37 = vpop.f32.mrf.mxu0 }
 0x6db   :  { %v1251_v63 = vadd.f32 %v1250_v37, %v1071_v56  ;;  %v1236_v37 = vadd.f32 %v1235_v49, %v1051_v53 }
 0x6e2   :  { %v1253_v57 = vpop.f32.mrf.mxu0 }
 0x6e3   :  { %v1254_v11 = vadd.f32 %v1253_v57, %v1075_v31  ;;  %v1124_v57 = vpop.permute.xlu1 %1123 }
 0x6e5   :  { %v1303_v61 = vmax.f32 %v1254_v11, 0.0  ;;  %v3534_v11 = vld [vmem:[%s4018_s5 + $0x20] sm:$0xff] }
 0x6ea   :  { %v1256_v62 = vpop.f32.mrf.mxu0 }
 0x6eb   :  { %v1257_v15 = vadd.f32 %v1256_v62, %v1079_v5  ;;  %v1242_v5 = vadd.f32 %v1241_v3, %v1059_v20  ;;  %v1301_v62 = vmax.f32 %v1248_v43, 0.0 }
 0x6ed   :  { %v1304_v1 = vmax.f32 %v1257_v15, 0.0  ;;  %v1299_v56 = vmax.f32 %v1242_v5, 0.0 }
 0x6f2   :  { %v1259_v39 = vpop.f32.mrf.mxu0 }
 0x6f3   :  { %v1260_v24 = vadd.f32 %v1259_v39, %v1083_v28  ;;  %v1302_v28 = vmax.f32 %v1251_v63, 0.0  ;;  %v3510_v39 = vpop.permute.xlu2 %1128  ;;  %v1320_v63 = vld [vmem:[%s4015_s2 + $0x20] sm:$0xff] }
 0x6f5   :  { %v1305_v32 = vmax.f32 %v1260_v24, 0.0 }
 0x6fa   :  { %v1262_v45 = vpop.f32.mrf.mxu0 }
 0x6fb   :  { %v1263_v14 = vadd.f32 %v1262_v45, %v1087_v26  ;;  %v1047_v26 = vpop.permute.xlu0 %1046  ;;  %v1239_v45 = vadd.f32 %v1238_v47, %v1055_v46  ;;  %v1035_v3 = vpop.permute.xlu2 %1034 }
 0x6fc   :  { %v1233_v55 = vadd.f32 %v3490_v41, %v1047_v26  ;;  %v1031_v47 = vpop.permute.xlu1 %1030  ;;  %v1224_v49 = vadd.f32 %v3466_v10, %v1035_v3  ;;  %v1318_v10 = vld [vmem:[%s4015_s2 + $0x10] sm:$0xff] }
 0x6fd   :  { %v1306_v2 = vmax.f32 %v1263_v14, 0.0  ;;  %v1298_v51 = vmax.f32 %v1239_v45, 0.0  ;;  %v1297_v14 = vmax.f32 %v1236_v37, 0.0  ;;  %v1221_v41 = vadd.f32 %v3454_v42, %v1031_v47  ;;  %v3525_v42 = vld [vmem:[%s4018_s5 + $0x28] sm:$0xff]  ;;  %v1324_v37 = vld [vmem:[%s4015_s2 + $0x40] sm:$0xff]  ;;  %v1326_v47 = vld [vmem:[%s4015_s2 + $0x50] sm:$0xff] }
 0x6fe   :  { %v1296_v24 = vmax.f32 %v1233_v55, 0.0  ;;  %v1293_v53 = vmax.f32 %v1224_v49, 0.0 }
 0x6ff   :  { %v1292_v15 = vmax.f32 %v1221_v41, 0.0 }
 0x702   :  { %v1265_v19 = vpop.f32.mrf.mxu0 }
 0x703   :  { %v1266_v23 = vadd.f32 %v1265_v19, %v1091_v9  ;;  %v1245_v9 = vadd.f32 %v1244_v33, %v1063_v36  ;;  %v1039_v33 = vpop.permute.xlu0 %1038  ;;  %v1230_v36 = vadd.f32 %v3484_v35, %v1043_v6  ;;  %v2598_v6 = vmov 5   ;;  %v1114_v26 = vpop.permute.xlu2 %1113 }
 0x704   :  { %v1227_v20 = vadd.f32 %v3478_v50, %v1039_v33  ;;  %v1316_v50 = vld [vmem:[%s4015_s2] sm:$0xff]  ;;  %2477 = vset.pattern.permute.xlu1 %v2598_v6  ;;  %2478 = vset.pattern.permute.xlu2 %v2598_v6 }
 0x705   :  { %v1307_v4 = vmax.f32 %v1266_v23, 0.0  ;;  %v1300_v19 = vmax.f32 %v1245_v9, 0.0  ;;  %v1295_v46 = vmax.f32 %v1230_v36, 0.0  ;;  %1349 = vperm.xlu1 %2477, %v3525_v42   ;;  %2479 = vset.pattern.permute.xlu0 %v2598_v6 }
 0x706   :  { %1345 = vperm.xlu2 %2478, %v3534_v11   ;;  %1341 = vperm.xlu0 %2479, %v3264_v7  }
 0x707   :  { %1371 = vmatpush.msra.mxu2 %v1307_v4  ;;  %v1294_v4 = vmax.f32 %v1227_v20, 0.0 }
 0x709   :  { %1372 = vmatpush.msra.mxu2 %v1306_v2 }
 0x70a   :  { %v3508_v58 = vpop.f32.mrf.mxu0 }
 0x70b   :  { %1373 = vmatpush.msra.mxu2 %v1305_v32  ;;  %v1099_v36 = vpop.permute.xlu2 %1098 }
 0x70d   :  { %1374 = vmatpush.msra.mxu2 %v1304_v1  ;;  %1337 = vperm.xlu1 %2477, %v3270_v8   ;;  %v1119_v1 = vpop.permute.xlu0 %1118 }
 0x70e   :  { %1333 = vperm.xlu2 %2478, %v3371_v34  }
 0x70f   :  { %1375 = vmatpush.msra.mxu2 %v1303_v61  ;;  %v1322_v61 = vld [vmem:[%s4015_s2 + $0x30] sm:$0xff] }
 0x711   :  { %1376 = vmatpush.msra.mxu2 %v1302_v28 }
 0x712   :  { %v3512_v31 = vpop.f32.mrf.mxu0 }
 0x713   :  { %1377 = vmatpush.msra.mxu2 %v1301_v62 }
 0x715   :  { %1378 = vmatpush.msra.mxu2 %v1300_v19  ;;  %1329 = vperm.xlu1 %2477, %v3304_v52   ;;  %v1109_v9 = vpop.permute.xlu0 %1108 }
 0x717   :  { %1379 = vmatpush.msra.mxu2 %v1299_v56 }
 0x719   :  { %1380 = vmatpush.msra.mxu2 %v1298_v51 }
 0x71a   :  { %v1274_v23 = vpop.f32.mrf.mxu0 }
 0x71b   :  { %1381 = vmatpush.msra.mxu2 %v1297_v14  ;;  %v1104_v14 = vpop.permute.xlu1 %1103 }
 0x71c   :  { %v1275_v3 = vadd.f32 %v1274_v23, %v1104_v14  ;;  %v1317_v23 = vld [vmem:[%s4015_s2 + $0x8] sm:$0xff] }
 0x71d   :  { %1382 = vmatpush.msra.mxu2 %v1296_v24 }
 0x71f   :  { %1383 = vmatpush.msra.mxu2 %v1295_v46  ;;  %v1310_v46 = vmax.f32 %v1275_v3, 0.0 }
 0x721   :  { %1384 = vmatpush.msra.mxu2 %v1294_v4 }
 0x722   :  { %v1277_v35 = vpop.f32.mrf.mxu0 }
 0x723   :  { %1385 = vmatpush.msra.mxu2 %v1293_v53  ;;  %v1278_v51 = vadd.f32 %v1277_v35, %v1109_v9  ;;  %v1323_v53 = vld [vmem:[%s4015_s2 + $0x38] sm:$0xff]  ;;  %v1325_v35 = vld [vmem:[%s4015_s2 + $0x48] sm:$0xff] }
 0x725   :  { %1386 = vmatpush.msra.mxu2 %v1292_v15  ;;  %v1311_v24 = vmax.f32 %v1278_v51, 0.0  ;;  %v1327_v15 = vld [vmem:[%s4015_s2 + $0x58] sm:$0xff] }
 0x726   :  { %1387 = vmatmul.f32.vlgmr.msra.gmra.mxu2 %v1316_v50 }
 0x72a   :  { %v1280_v2 = vpop.f32.mrf.mxu0 }
 0x72b   :  { %v1281_v56 = vadd.f32 %v1280_v2, %v1114_v26 }
 0x72d   :  { %v1312_v20 = vmax.f32 %v1281_v56, 0.0 }
 0x72e   :  { %1390 = vmatmul.f32.gmra.mxu2 %v1318_v10 }
 0x732   :  { %v1283_v32 = vpop.f32.mrf.mxu0 }
 0x733   :  { %v1284_v45 = vadd.f32 %v1283_v32, %v1119_v1 }
 0x735   :  { %v1313_v33 = vmax.f32 %v1284_v45, 0.0 }
 0x736   :  { %1393 = vmatmul.f32.gmra.mxu2 %v1320_v63 }
 0x73a   :  { %v1286_v43 = vpop.f32.mrf.mxu0 }
 0x73b   :  { %v1287_v5 = vadd.f32 %v1286_v43, %v1124_v57  ;;  %v1095_v57 = vpop.permute.xlu0 %1094 }
 0x73c   :  { %v1269_v49 = vadd.f32 %v3508_v58, %v1095_v57  ;;  %v1321_v58 = vld [vmem:[%s4015_s2 + $0x28] sm:$0xff] }
 0x73d   :  { %v1314_v55 = vmax.f32 %v1287_v5, 0.0 }
 0x73e   :  { %1396 = vmatmul.f32.gmra.mxu2 %v1322_v61  ;;  %v1308_v4 = vmax.f32 %v1269_v49, 0.0 }
 0x742   :  { %v1289_v28 = vpop.f32.mrf.mxu0 }
 0x743   :  { %v1290_v62 = vadd.f32 %v1289_v28, %v3510_v39  ;;  %v1272_v39 = vadd.f32 %v3512_v31, %v1099_v36  ;;  %v1319_v31 = vld [vmem:[%s4015_s2 + $0x18] sm:$0xff] }
 0x745   :  { %v1315_v19 = vmax.f32 %v1290_v62, 0.0  ;;  %v1309_v41 = vmax.f32 %v1272_v39, 0.0 }
 0x746   :  { %1399 = vmatmul.f32.gmra.mxu2 %v1324_v37 }
 0x747   :  { %1414 = vmatpush.msra.mxu1 %v1315_v19 }
 0x749   :  { %1415 = vmatpush.msra.mxu1 %v1314_v55 }
 0x74b   :  { %1416 = vmatpush.msra.mxu1 %v1313_v33 }
 0x74d   :  { %1417 = vmatpush.msra.mxu1 %v1312_v20 }
 0x74e   :  { %1402 = vmatmul.f32.gmra.mxu2 %v1326_v47 }
 0x74f   :  { %1418 = vmatpush.msra.mxu1 %v1311_v24 }
 0x751   :  { %1419 = vmatpush.msra.mxu1 %v1310_v46 }
 0x753   :  { %1420 = vmatpush.msra.mxu1 %v1309_v41 }
 0x755   :  { %1421 = vmatpush.msra.mxu1 %v1308_v4 }
 0x756   :  { %2380 = vmatmul.msk.f32.vlgmr.msra.gmra.mxu1 %vm1352_vm6, %v1317_v23 }
 0x75e   :  { %2381 = vmatmul.msk.f32.gmra.mxu1 %vm1352_vm6, %v1319_v31 }
 0x760   :  { %v1346_v9 = vpop.permute.xlu2 %1345 }
 0x766   :  { %2382 = vmatmul.msk.f32.gmra.mxu1 %vm1352_vm6, %v1321_v58 }
 0x768   :  { %v1334_v55 = vpop.permute.xlu2 %1333 }
 0x76e   :  { %2383 = vmatmul.msk.f32.gmra.mxu1 %vm1352_vm6, %v1323_v53 }
 0x776   :  { %2384 = vmatmul.msk.f32.gmra.mxu1 %vm1352_vm6, %v1325_v35 }
 0x777   :  { %v1350_v43 = vpop.permute.xlu1 %1349 }
 0x778   :  { %v1342_v62 = vpop.permute.xlu0 %1341 }
 0x77e   :  { %2385 = vmatmul.msk.f32.gmra.mxu1 %vm1352_vm6, %v1327_v15 }
 0x77f   :  { %v1338_v28 = vpop.permute.xlu1 %1337 }
 0x787   :  { %v1330_v3 = vpop.permute.xlu1 %1329 }
 0x7a9   :  { %v1388_v50 = vpop.f32.mrf.mxu2 }
 0x7aa   :  { %v1389_v24 = vadd.f32 %v1388_v50, %v1330_v3  ;;  %v2600_v50 = vmov 6  }
 0x7ab   :  { %2481 = vset.pattern.permute.xlu0 %v2600_v50  ;;  %2480 = vset.pattern.permute.xlu2 %v2600_v50 }
 0x7ac   :  { %1612 = vperm.xlu0 %2481, %v3534_v11   ;;  %1616 = vperm.xlu2 %2480, %v3525_v42  }
 0x7b1   :  { %v1391_v2 = vpop.f32.mrf.mxu2 }
 0x7b2   :  { %v1392_v20 = vadd.f32 %v1391_v2, %v1334_v55 }
 0x7b4   :  { %1608 = vperm.xlu2 %2480, %v3264_v7  }
 0x7b9   :  { %v1394_v10 = vpop.f32.mrf.mxu2 }
 0x7ba   :  { %v1395_v33 = vadd.f32 %v1394_v10, %v1338_v28 }
 0x7bc   :  { %1604 = vperm.xlu2 %2480, %v3270_v8  }
 0x7c1   :  { %v1397_v63 = vpop.f32.mrf.mxu2 }
 0x7c2   :  { %v1398_v37 = vadd.f32 %v1397_v63, %v1342_v62 }
 0x7c9   :  { %v1400_v26 = vpop.f32.mrf.mxu2 }
 0x7ca   :  { %v1401_v19 = vadd.f32 %v1400_v26, %v1346_v9 }
 0x7d1   :  { %v1403_v45 = vpop.f32.mrf.mxu2 }
 0x7d2   :  { %v1404_v56 = vadd.f32 %v1403_v45, %v1350_v43 }
 0x7d3   :  { %v1423_v6 = vpop.f32.mrf.mxu1 }
 0x7d4   :  { %v1424_v4 = vadd.f32 %v1423_v6, %v1389_v24 }
 0x7d6   :  { %v1441_v58 = vadd.f32 %v1424_v4, %v3350_v17  ;;  %v2599_v17 = vmov 7  }
 0x7d7   :  { %2482 = vset.pattern.permute.xlu1 %v2599_v17  ;;  %2483 = vset.pattern.permute.xlu0 %v2599_v17 }
 0x7d8   :  { %1646 = vperm.xlu1 %2482, %v3525_v42   ;;  %1638 = vperm.xlu0 %2483, %v3264_v7  }
 0x7d9   :  { %2485 = vset.pattern.permute.xlu2 %v2599_v17 }
 0x7da   :  { %1634 = vperm.xlu2 %2485, %v3270_v8  }
 0x7db   :  { %v1426_v32 = vpop.f32.mrf.mxu1 }
 0x7dc   :  { %v1427_v46 = vadd.f32 %v1426_v32, %v1392_v20 }
 0x7de   :  { %v1442_v31 = vadd.f32 %v1427_v46, %v3347_v40 }
 0x7e0   :  { %1642 = vperm.xlu1 %2482, %v3534_v11   ;;  %1626 = vperm.xlu0 %2483, %v3304_v52  }
 0x7e2   :  { %1630 = vperm.xlu2 %2485, %v3371_v34  }
 0x7e3   :  { %v1429_v1 = vpop.f32.mrf.mxu1 }
 0x7e4   :  { %v1430_v47 = vadd.f32 %v1429_v1, %v1395_v33 }
 0x7e6   :  { %v1443_v23 = vadd.f32 %v1430_v47, %v3344_v38 }
 0x7e8   :  { %2484 = vset.pattern.permute.xlu1 %v2600_v50 }
 0x7e9   :  { %1600 = vperm.xlu1 %2484, %v3371_v34  }
 0x7eb   :  { %v1432_v61 = vpop.f32.mrf.mxu1 }
 0x7ec   :  { %v1433_v57 = vadd.f32 %v1432_v61, %v1398_v37 }
 0x7ee   :  { %v1444_v41 = vadd.f32 %v1433_v57, %v3342_v22 }
 0x7f1   :  { %1596 = vperm.xlu1 %2484, %v3304_v52  }
 0x7f3   :  { %v1435_v5 = vpop.f32.mrf.mxu1 }
 0x7f4   :  { %v1436_v36 = vadd.f32 %v1435_v5, %v1401_v19 }
 0x7f6   :  { %v1445_v49 = vadd.f32 %v1436_v36, %v3339_v59 }
 0x7fb   :  { %v1438_v51 = vpop.f32.mrf.mxu1 }
 0x7fc   :  { %v1439_v14 = vadd.f32 %v1438_v51, %v1404_v56 }
 0x7fe   :  { %v1446_v39 = vadd.f32 %v1439_v14, %v3333_v44 }
 0x800   :  { %1457 = vmatpush.msrb.mxu2 %v1446_v39 }
 0x802   :  { %1458 = vmatpush.msrb.mxu2 %v1445_v49 }
 0x804   :  { %1459 = vmatpush.msrb.mxu2 %v1444_v41 }
 0x806   :  { %1460 = vmatpush.msrb.mxu2 %v1443_v23  ;;  %v3653_v5 = vpop.permute.xlu2 %1616 }
 0x808   :  { %1461 = vmatpush.msrb.mxu2 %v1442_v31 }
 0x80a   :  { %1462 = vmatpush.msrb.mxu2 %v1441_v58 }
 0x80b   :  { %2386 = vmatmul.msk.f32.vlgmr.msrb.gmra.mxu2 %vm69_vm0, %v3130_v21 }
 0x80e   :  { %v3672_v51 = vpop.permute.xlu2 %1608 }
 0x813   :  { %2387 = vmatmul.msk.f32.gmra.mxu2 %vm69_vm0, %v3137_v16 }
 0x81b   :  { %2388 = vmatmul.msk.f32.gmra.mxu2 %vm69_vm0, %v3144_v12 }
 0x81e   :  { %v1613_v50 = vpop.permute.xlu0 %1612 }
 0x823   :  { %2389 = vmatmul.msk.f32.gmra.mxu2 %vm69_vm0, %v3151_v13 }
 0x82b   :  { %2390 = vmatmul.msk.f32.gmra.mxu2 %vm69_vm0, %v3158_v18 }
 0x833   :  { %2391 = vmatmul.msk.f32.gmra.mxu2 %vm69_vm0, %v3165_v25 }
 0x84a   :  { %v3666_v37 = vpop.permute.xlu1 %1646 }
 0x88e   :  { %v1464_v44 = vpop.f32.mrf.mxu2 }
 0x88f   :  { %v3618_v43 = vsub.f32 %v1441_v58, %v1464_v44 }
 0x891   :  { %v1488_v9 = vmul.f32 %v3618_v43, %v3618_v43 }
 0x896   :  { %v1467_v59 = vpop.f32.mrf.mxu2 }
 0x897   :  { %v3614_v63 = vsub.f32 %v1442_v31, %v1467_v59  ;;  %v1643_v31 = vpop.permute.xlu1 %1642 }
 0x899   :  { %v1489_v26 = vmul.f32 %v3614_v63, %v3614_v63 }
 0x89e   :  { %v1470_v22 = vpop.f32.mrf.mxu2 }
 0x89f   :  { %v3610_v10 = vsub.f32 %v1443_v23, %v1470_v22 }
 0x8a1   :  { %v1490_v61 = vmul.f32 %v3610_v10, %v3610_v10 }
 0x8a6   :  { %v1473_v38 = vpop.f32.mrf.mxu2 }
 0x8a7   :  { %v3605_v2 = vsub.f32 %v1444_v41, %v1473_v38  ;;  %v1605_v38 = vpop.permute.xlu2 %1604 }
 0x8a9   :  { %v1491_v1 = vmul.f32 %v3605_v2, %v3605_v2 }
 0x8ae   :  { %v1476_v40 = vpop.f32.mrf.mxu2 }
 0x8af   :  { %v3599_v35 = vsub.f32 %v1445_v49, %v1476_v40 }
 0x8b1   :  { %v1492_v32 = vmul.f32 %v3599_v35, %v3599_v35 }
 0x8b6   :  { %v1479_v53 = vpop.f32.mrf.mxu2 }
 0x8b7   :  { %v3601_v15 = vsub.f32 %v1446_v39, %v1479_v53 }
 0x8b9   :  { %v1493_v6 = vmul.f32 %v3601_v15, %v3601_v15 }
 0x8bb   :  { %1504 = vmatpush.msra.mxu2 %v1493_v6 }
 0x8bd   :  { %1505 = vmatpush.msra.mxu2 %v1492_v32 }
 0x8bf   :  { %1506 = vmatpush.msra.mxu2 %v1491_v1 }
 0x8c1   :  { %1507 = vmatpush.msra.mxu2 %v1490_v61 }
 0x8c3   :  { %1508 = vmatpush.msra.mxu2 %v1489_v26 }
 0x8c5   :  { %1509 = vmatpush.msra.mxu2 %v1488_v9 }
 0x8c6   :  { %2392 = vmatmul.msk.f32.vlgmr.msra.gmra.mxu2 %vm69_vm0, %v3130_v21 }
 0x8ce   :  { %2393 = vmatmul.msk.f32.gmra.mxu2 %vm69_vm0, %v3137_v16 }
 0x8d6   :  { %2394 = vmatmul.msk.f32.gmra.mxu2 %vm69_vm0, %v3144_v12 }
 0x8de   :  { %2395 = vmatmul.msk.f32.gmra.mxu2 %vm69_vm0, %v3151_v13 }
 0x8e6   :  { %2396 = vmatmul.msk.f32.gmra.mxu2 %vm69_vm0, %v3158_v18 }
 0x8ee   :  { %2397 = vmatmul.msk.f32.gmra.mxu2 %vm69_vm0, %v3165_v25 }
 0x949   :  { %v1511_v21 = vpop.f32.mrf.mxu2 }
 0x94a   :  { %v3655_v13 = vadd.f32 1e-05, %v1511_v21 }
 0x951   :  { %v1514_v7 = vpop.f32.mrf.mxu2 }
 0x952   :  { %v3650_v12 = vadd.f32 1e-05, %v1514_v7 }
 0x959   :  { %v1517_v16 = vpop.f32.mrf.mxu2 }
 0x95a   :  { %v3648_v8 = vadd.f32 1e-05, %v1517_v16 }
 0x95c   :  { %vm1555_vm15 = vweird.f32 %v3648_v8 }
 0x961   :  { %v1520_v52 = vpop.f32.mrf.mxu2 }
 0x962   :  { %v3646_v28 = vadd.f32 1e-05, %v1520_v52 }
 0x964   :  { %2518 = vrsqrt.f32 %v3646_v28  ;;  %vm1565_vm11 = vweird.f32 %v3646_v28 }
 0x965   :  { %2520 = vrsqrt.f32 %v3648_v8 }
 0x966   :  { %2522 = vrsqrt.f32 %v3650_v12 }
 0x967   :  { %2524 = vrsqrt.f32 %v3655_v13 }
 0x969   :  { %v1523_v18 = vpop.f32.mrf.mxu2 }
 0x96a   :  { %v1524_v25 = vadd.f32 1e-05, %v1523_v18  ;;  %v3660_v62 = vpop.eup %2518 }
 0x96b   :  { %v3662_v45 = vpop.eup %2520  ;;  %v1560_v56 = vmul.f32 %v3660_v62, %v3646_v28  ;;  %vm1566_vm8 = vweird.f32 %v3660_v62  ;;  %v1601_v28 = vpop.permute.xlu1 %1600 }
 0x96c   :  { %2526 = vrsqrt.f32 %v1524_v25  ;;  %v3664_v19 = vpop.eup %2522  ;;  %v1550_v33 = vmul.f32 %v3662_v45, %v3648_v8  ;;  %vm1575_vm9 = vweird.f32 %v1524_v25  ;;  %vm1556_vm10 = vweird.f32 %v3662_v45  ;;  %vm3697_vm1 = vmor %vm1565_vm11, %vm1566_vm8 }
 0x96d   :  { %v3670_v55 = vpop.eup %2524  ;;  %v1540_v3 = vmul.f32 %v3664_v19, %v3650_v12  ;;  %v1561_v57 = vmul.f32 %v3660_v62, %v1560_v56  ;;  %vm1546_vm14 = vweird.f32 %v3664_v19  ;;  %vm3702_vm2 = vmor %vm1555_vm15, %vm1556_vm10 }
 0x96e   :  { %v1530_v24 = vmul.f32 %v3670_v55, %v3655_v13  ;;  %v1551_v47 = vmul.f32 %v3662_v45, %v1550_v33  ;;  %vm1536_vm4 = vweird.f32 %v3670_v55  ;;  %v3800_v33 = vld [vmem:[%s4018_s5 + $0x10] sm:$0xff] }
 0x96f   :  { %v1541_v46 = vmul.f32 %v3664_v19, %v1540_v3  ;;  %v1562_v41 = vmul.f32 0.5, %v1561_v57  ;;  %v1635_v57 = vpop.permute.xlu2 %1634 }
 0x970   :  { %v1531_v23 = vmul.f32 %v3670_v55, %v1530_v24  ;;  %v1552_v58 = vmul.f32 0.5, %v1551_v47 }
 0x971   :  { %v1526_v36 = vpop.f32.mrf.mxu2  ;;  %v1542_v22 = vmul.f32 0.5, %v1541_v46  ;;  %v1563_v40 = vsub.f32 1.5, %v1562_v41 }
 0x972   :  { %v2527_v14 = vpop.eup %2526  ;;  %v1527_v20 = vadd.f32 1e-05, %v1526_v36  ;;  %v1532_v53 = vmul.f32 0.5, %v1531_v23  ;;  %v1553_v6 = vsub.f32 1.5, %v1552_v58 }
 0x973   :  { %v1570_v39 = vmul.f32 %v2527_v14, %v1524_v25  ;;  %vm1576_vm7 = vweird.f32 %v2527_v14  ;;  %v1543_v61 = vsub.f32 1.5, %v1542_v22  ;;  %v1564_v26 = vmul.f32 %v3660_v62, %v1563_v40  ;;  %v1597_v23 = vpop.permute.xlu1 %1596  ;;  %v1660_v40 = vld [vmem:[%s4014_s1 + $0x1d8] sm:$0xff] }
 0x974   :  { %2528 = vrsqrt.f32 %v1527_v20  ;;  %v1533_v21 = vsub.f32 1.5, %v1532_v53  ;;  %vm3688_vm12 = vmor %vm1575_vm9, %vm1576_vm7  ;;  %v1554_v16 = vmul.f32 %v3662_v45, %v1553_v6  ;;  %vm1585_vm3 = vweird.f32 %v1527_v20  ;;  %v2542_v6 = vld [vmem:[%s4018_s5 + $0x78] sm:$0xff] }
 0x975   :  { %v1571_v49 = vmul.f32 %v2527_v14, %v1570_v39  ;;  %v1544_v56 = vmul.f32 %v3664_v19, %v1543_v61  ;;  %v1568_v36 = vsel %vm3697_vm1, %v3660_v62, %v1564_v26  ;;  %vm1545_vm7 = vweird.f32 %v3650_v12  ;;  %v1639_v12 = vpop.permute.xlu0 %1638  ;;  %v2545_v26 = vld [vmem:[%s4018_s5 + $0x60] sm:$0xff]  ;;  %v2550_v25 = vld [vmem:[%s4018_s5 + $0x38] sm:$0xff] }
 0x976   :  { %v1534_v3 = vmul.f32 %v3670_v55, %v1533_v21  ;;  %v1558_v39 = vsel %vm3702_vm2, %v3662_v45, %v1554_v16  ;;  %vm1547_vm8 = vmor %vm1545_vm7, %vm1546_vm14  ;;  %vm1535_vm9 = vweird.f32 %v3655_v13  ;;  %v2547_v21 = vld [vmem:[%s4018_s5 + $0x40] sm:$0xff]  ;;  %v2548_v16 = vld [vmem:[%s4018_s5 + $0x50] sm:$0xff] }
 0x977   :  { %v1572_v4 = vmul.f32 0.5, %v1571_v49  ;;  %vm1537_vm10 = vmor %vm1535_vm9, %vm1536_vm4  ;;  %v1591_v47 = vmul.f32 %v1558_v39, %v3610_v10  ;;  %v1725_v39 = vld [vmem:[%s4014_s1 + $0x238] sm:$0xff] }
 0x978   :  { %v1538_v45 = vsel %vm1537_vm10, %v3670_v55, %v1534_v3  ;;  %v1723_v3 = vld [vmem:[%s4014_s1 + $0x228] sm:$0xff] }
 0x979   :  { %v1573_v44 = vsub.f32 1.5, %v1572_v4  ;;  %v1621_v13 = vmul.f32 %v1605_v38, %v1591_v47  ;;  %v1659_v38 = vld [vmem:[%s4014_s1 + $0x1d0] sm:$0xff] }
 0x97a   :  { %v2529_v59 = vpop.eup %2528 }
 0x97b   :  { %v1580_v17 = vmul.f32 %v2529_v59, %v1527_v20  ;;  %v1574_v32 = vmul.f32 %v2527_v14, %v1573_v44  ;;  %vm1586_vm13 = vweird.f32 %v2529_v59  ;;  %v1592_v20 = vmul.f32 %v1568_v36, %v3605_v2  ;;  %v1631_v44 = vpop.permute.xlu2 %1630  ;;  %v1715_v36 = vld [vmem:[%s4014_s1 + $0x1e8] sm:$0xff] }
 0x97c   :  { %vm1587_vm5 = vmor %vm1585_vm3, %vm1586_vm13  ;;  %v1589_v2 = vmul.f32 %v1538_v45, %v3618_v43  ;;  %v1655_v43 = vld [vmem:[%s4014_s1 + $0x1b0] sm:$0xff] }
 0x97d   :  { %v1581_v1 = vmul.f32 %v2529_v59, %v1580_v17  ;;  %v1578_v52 = vsel %vm3688_vm12, %v2527_v14, %v1574_v32  ;;  %v1627_v55 = vpop.permute.xlu0 %1626  ;;  %v2543_v32 = vld [vmem:[%s4018_s5 + $0x70] sm:$0xff] }
 0x97e   :  { %v1593_v8 = vmul.f32 %v1578_v52, %v3599_v35  ;;  %v1548_v35 = vsel %vm1547_vm8, %v3664_v19, %v1544_v56  ;;  %v2549_v52 = vld [vmem:[%s4018_s5 + $0x48] sm:$0xff]  ;;  %v1732_v45 = vld [vmem:[%s4014_s1 + $0x270] sm:$0xff] }
 0x97f   :  { %v1582_v9 = vmul.f32 0.5, %v1581_v1  ;;  %v1590_v41 = vmul.f32 %v1548_v35, %v3614_v63  ;;  %v2544_v1 = vld [vmem:[%s4018_s5 + $0x68] sm:$0xff]  ;;  %v1729_v35 = vld [vmem:[%s4014_s1 + $0x258] sm:$0xff] }
 0x980   :  { %v1623_v46 = vmul.f32 %v1613_v50, %v1593_v8  ;;  %v2601_v50 = vmov 8   ;;  %v1722_v8 = vld [vmem:[%s4014_s1 + $0x220] sm:$0xff] }
 0x981   :  { %v1583_v18 = vsub.f32 1.5, %v1582_v9  ;;  %v1620_v58 = vmul.f32 %v1601_v28, %v1590_v41  ;;  %2486 = vset.pattern.permute.xlu1 %v2601_v50  ;;  %2487 = vset.pattern.permute.xlu2 %v2601_v50  ;;  %v2546_v9 = vld [vmem:[%s4018_s5 + $0x58] sm:$0xff]  ;;  %v2551_v28 = vld [vmem:[%s4018_s5 + $0x30] sm:$0xff] }
 0x982   :  { %v1653_v19 = vadd.f32 %v1643_v31, %v1623_v46  ;;  %v1658_v31 = vld [vmem:[%s4014_s1 + $0x1c8] sm:$0xff]  ;;  %2488 = vset.pattern.permute.xlu0 %v2601_v50  ;;  %1799 = vperm.xlu1 %2486, %v2542_v6  }
 0x983   :  { %v1584_v14 = vmul.f32 %v2529_v59, %v1583_v18  ;;  %v1650_v22 = vadd.f32 %v1631_v44, %v1620_v58  ;;  %1795 = vperm.xlu2 %2487, %v2543_v32   ;;  %1791 = vperm.xlu0 %2488, %v2544_v1   ;;  %v1736_v58 = vld [vmem:[%s4014_s1 + $0x290] sm:$0xff]  ;;  %v1737_v44 = vld [vmem:[%s4014_s1 + $0x298] sm:$0xff] }
 0x985   :  { %v1588_v24 = vsel %vm1587_vm5, %v2529_v59, %v1584_v14  ;;  %v1651_v59 = vadd.f32 %v1635_v57, %v1621_v13  ;;  %v3815_v14 = vld [vmem:[%s4018_s5] sm:$0xff]  ;;  %v1724_v57 = vld [vmem:[%s4014_s1 + $0x230] sm:$0xff] }
 0x986   :  { %v1594_v62 = vmul.f32 %v1588_v24, %v3601_v15  ;;  %v1622_v15 = vmul.f32 %v3672_v51, %v1592_v20  ;;  %v1657_v51 = vld [vmem:[%s4014_s1 + $0x1c0] sm:$0xff]  ;;  %v1728_v20 = vld [vmem:[%s4014_s1 + $0x250] sm:$0xff] }
 0x987   :  { %v1726_v24 = vld [vmem:[%s4014_s1 + $0x240] sm:$0xff] }
 0x988   :  { %v1624_v49 = vmul.f32 %v3653_v5, %v1594_v62  ;;  %v1652_v10 = vadd.f32 %v1639_v12, %v1622_v15  ;;  %v1619_v5 = vmul.f32 %v1597_v23, %v1589_v2  ;;  %v1727_v62 = vld [vmem:[%s4014_s1 + $0x248] sm:$0xff]  ;;  %v1730_v12 = vld [vmem:[%s4014_s1 + $0x260] sm:$0xff] }
 0x989   :  { %v1734_v2 = vld [vmem:[%s4014_s1 + $0x280] sm:$0xff] }
 0x98a   :  { %v1654_v4 = vadd.f32 %v3666_v37, %v1624_v49  ;;  %v1649_v63 = vadd.f32 %v1627_v55, %v1619_v5  ;;  %v1656_v37 = vld [vmem:[%s4014_s1 + $0x1b8] sm:$0xff]  ;;  %1787 = vperm.xlu1 %2486, %v2545_v26   ;;  %v1731_v49 = vld [vmem:[%s4014_s1 + $0x268] sm:$0xff] }
 0x98b   :  { %1783 = vperm.xlu2 %2487, %v2546_v9   ;;  %1771 = vperm.xlu0 %2488, %v2547_v21  }
 0x98c   :  { %1689 = vmatpush.msrb.mxu1 %v1654_v4  ;;  %v1733_v4 = vld [vmem:[%s4014_s1 + $0x278] sm:$0xff] }
 0x98e   :  { %1690 = vmatpush.msrb.mxu1 %v1653_v19  ;;  %v1735_v19 = vld [vmem:[%s4014_s1 + $0x288] sm:$0xff] }
 0x990   :  { %1691 = vmatpush.msrb.mxu1 %v1652_v10 }
 0x992   :  { %1692 = vmatpush.msrb.mxu1 %v1651_v59  ;;  %1779 = vperm.xlu1 %2486, %v2548_v16  }
 0x993   :  { %1775 = vperm.xlu2 %2487, %v2549_v52   ;;  %1759 = vperm.xlu0 %2488, %v3525_v42   ;;  %v3789_v42 = vld [vmem:[%s4018_s5 + $0x18] sm:$0xff] }
 0x994   :  { %1693 = vmatpush.msrb.mxu1 %v1650_v22 }
 0x996   :  { %1694 = vmatpush.msrb.mxu1 %v1649_v63 }
 0x997   :  { %2398 = vmatmul.msk.f32.vlgmr.msrb.gmra.mxu1 %vm69_vm0, %v1655_v43 }
 0x99a   :  { %1767 = vperm.xlu1 %2486, %v2550_v25  }
 0x99b   :  { %1763 = vperm.xlu2 %2487, %v2551_v28   ;;  %1831 = vperm.xlu0 %2488, %v3361_v0   ;;  %v1714_v0 = vld [vmem:[%s4014_s1 + $0x1e0] sm:$0xff] }
 0x99f   :  { %2399 = vmatmul.msk.f32.gmra.mxu1 %vm69_vm0, %v1656_v37 }
 0x9a2   :  { %1755 = vperm.xlu1 %2486, %v3534_v11  }
 0x9a3   :  { %1751 = vperm.xlu2 %2487, %v3789_v42   ;;  %1743 = vperm.xlu0 %2488, %v3371_v34   ;;  %v2554_v34 = vld [vmem:[%s4018_s5 + $0xb0] sm:$0xff] }
 0x9a7   :  { %2400 = vmatmul.msk.f32.gmra.mxu1 %vm69_vm0, %v1657_v51 }
 0x9aa   :  { %1747 = vperm.xlu1 %2486, %v3800_v33  }
 0x9ab   :  { %1827 = vperm.xlu2 %2487, %v2554_v34   ;;  %1819 = vperm.xlu0 %2488, %v3463_v60   ;;  %v1716_v60 = vld [vmem:[%s4014_s1 + $0x1f0] sm:$0xff] }
 0x9af   :  { %2401 = vmatmul.msk.f32.gmra.mxu1 %vm69_vm0, %v1658_v31 }
 0x9b2   :  { %1823 = vperm.xlu1 %2486, %v3417_v27   ;;  %v1717_v27 = vld [vmem:[%s4014_s1 + $0x1f8] sm:$0xff] }
 0x9b3   :  { %1739 = vperm.xlu2 %2487, %v3815_v14   ;;  %1807 = vperm.xlu0 %2488, %v3475_v48   ;;  %v1718_v48 = vld [vmem:[%s4014_s1 + $0x200] sm:$0xff] }
 0x9b7   :  { %2402 = vmatmul.msk.f32.gmra.mxu1 %vm69_vm0, %v1659_v38 }
 0x9ba   :  { %1815 = vperm.xlu1 %2486, %v3427_v29   ;;  %v1719_v29 = vld [vmem:[%s4014_s1 + $0x208] sm:$0xff] }
 0x9bb   :  { %1811 = vperm.xlu2 %2487, %v3447_v30   ;;  %v1720_v30 = vld [vmem:[%s4014_s1 + $0x210] sm:$0xff] }
 0x9bf   :  { %2403 = vmatmul.msk.f32.gmra.mxu1 %vm69_vm0, %v1660_v40 }
 0x9c2   :  { %1803 = vperm.xlu1 %2486, %v3437_v54   ;;  %v1721_v54 = vld [vmem:[%s4014_s1 + $0x218] sm:$0xff] }
 0x9dd   :  { %v1796_v63 = vpop.permute.xlu2 %1795 }
 0x9e5   :  { %v1784_v51 = vpop.permute.xlu2 %1783 }
 0x9f4   :  { %v1800_v37 = vpop.permute.xlu1 %1799 }
 0x9f5   :  { %v1792_v40 = vpop.permute.xlu0 %1791 }
 0x9fc   :  { %v1788_v38 = vpop.permute.xlu1 %1787 }
 0x9fd   :  { %v1772_v32 = vpop.permute.xlu0 %1771 }
 0xa04   :  { %v1780_v50 = vpop.permute.xlu1 %1779 }
 0xa05   :  { %v1760_v52 = vpop.permute.xlu0 %1759 }
 0xa0c   :  { %v1768_v21 = vpop.permute.xlu1 %1767 }
 0xa14   :  { %v1696_v17 = vpop.f32.mrf.mxu1 }
 0xa1c   :  { %v1699_v53 = vpop.f32.mrf.mxu1 }
 0xa24   :  { %v1702_v61 = vpop.f32.mrf.mxu1 }
 0xa2c   :  { %v1705_v7 = vpop.f32.mrf.mxu1 }
 0xa34   :  { %v1708_v18 = vpop.f32.mrf.mxu1 }
 0xa3c   :  { %v1711_v56 = vpop.f32.mrf.mxu1 }
 0xa3d   :  { %1916 = vmatpush.msra.mxu3 %v1711_v56 }
 0xa3f   :  { %1917 = vmatpush.msra.mxu3 %v1708_v18 }
 0xa41   :  { %1918 = vmatpush.msra.mxu3 %v1705_v7 }
 0xa43   :  { %1919 = vmatpush.msra.mxu3 %v1702_v61 }
 0xa45   :  { %1920 = vmatpush.msra.mxu3 %v1699_v53  ;;  %v1776_v53 = vpop.permute.xlu2 %1775 }
 0xa47   :  { %1921 = vmatpush.msra.mxu3 %v1696_v17 }
 0xa48   :  { %2404 = vmatmul.msk.f32.vlgmr.msra.gmra.mxu3 %vm69_vm0, %v1714_v0 }
 0xa4d   :  { %v1764_v1 = vpop.permute.xlu2 %1763 }
 0xa50   :  { %2405 = vmatmul.msk.f32.gmra.mxu3 %vm69_vm0, %v1715_v36 }
 0xa55   :  { %v1752_v28 = vpop.permute.xlu2 %1751 }
 0xa58   :  { %2406 = vmatmul.msk.f32.gmra.mxu3 %vm69_vm0, %v1716_v60 }
 0xa60   :  { %2407 = vmatmul.msk.f32.gmra.mxu3 %vm69_vm0, %v1717_v27 }
 0xa68   :  { %2408 = vmatmul.msk.f32.gmra.mxu3 %vm69_vm0, %v1718_v48 }
 0xa70   :  { %2409 = vmatmul.msk.f32.gmra.mxu3 %vm69_vm0, %v1719_v29  ;;  %v1756_v29 = vpop.permute.xlu1 %1755 }
 0xa78   :  { %2410 = vmatmul.msk.f32.gmra.mxu3 %vm69_vm0, %v1720_v30 }
 0xa80   :  { %2411 = vmatmul.msk.f32.gmra.mxu3 %vm69_vm0, %v1721_v54 }
 0xa88   :  { %2412 = vmatmul.msk.f32.gmra.mxu3 %vm69_vm0, %v1722_v8  ;;  %v1832_v8 = vpop.permute.xlu0 %1831 }
 0xa90   :  { %2413 = vmatmul.msk.f32.gmra.mxu3 %vm69_vm0, %v1723_v3 }
 0xa98   :  { %2414 = vmatmul.msk.f32.gmra.mxu3 %vm69_vm0, %v1724_v57 }
 0xaa0   :  { %2415 = vmatmul.msk.f32.gmra.mxu3 %vm69_vm0, %v1725_v39  ;;  %v1828_v39 = vpop.permute.xlu2 %1827 }
 0xaa8   :  { %2416 = vmatmul.msk.f32.gmra.mxu3 %vm69_vm0, %v1726_v24 }
 0xab0   :  { %2417 = vmatmul.msk.f32.gmra.mxu3 %vm69_vm0, %v1727_v62 }
 0xab8   :  { %2418 = vmatmul.msk.f32.gmra.mxu3 %vm69_vm0, %v1728_v20 }
 0xac0   :  { %2419 = vmatmul.msk.f32.gmra.mxu3 %vm69_vm0, %v1729_v35 }
 0xac8   :  { %2420 = vmatmul.msk.f32.gmra.mxu3 %vm69_vm0, %v1730_v12 }
 0xacb   :  { %v3882_v47 = vpop.f32.mrf.mxu3 }
 0xad0   :  { %2421 = vmatmul.msk.f32.gmra.mxu3 %vm69_vm0, %v1731_v49 }
 0xad3   :  { %v3888_v46 = vpop.f32.mrf.mxu3 }
 0xad8   :  { %2422 = vmatmul.msk.f32.gmra.mxu3 %vm69_vm0, %v1732_v45 }
 0xadb   :  { %v3894_v41 = vpop.f32.mrf.mxu3 }
 0xae0   :  { %2423 = vmatmul.msk.f32.gmra.mxu3 %vm69_vm0, %v1733_v4  ;;  %v1748_v4 = vpop.permute.xlu1 %1747 }
 0xae3   :  { %v3900_v15 = vpop.f32.mrf.mxu3 }
 0xae8   :  { %2424 = vmatmul.msk.f32.gmra.mxu3 %vm69_vm0, %v1734_v2  ;;  %v1933_v2 = vadd.f32 %v3900_v15, %v1752_v28 }
 0xaeb   :  { %v3906_v13 = vpop.f32.mrf.mxu3 }
 0xaec   :  { %v1936_v45 = vadd.f32 %v3906_v13, %v1756_v29 }
 0xaf0   :  { %2425 = vmatmul.msk.f32.gmra.mxu3 %vm69_vm0, %v1735_v19 }
 0xaf3   :  { %v1938_v23 = vpop.f32.mrf.mxu3 }
 0xaf4   :  { %v1939_v35 = vadd.f32 %v1938_v23, %v1760_v52 }
 0xaf6   :  { %v2000_v19 = vmax.f32 %v1939_v35, 0.0  ;;  %v2028_v35 = vld [vmem:[%s4015_s2 + $0xa8] sm:$0xff] }
 0xaf8   :  { %2426 = vmatmul.msk.f32.gmra.mxu3 %vm69_vm0, %v1736_v58  ;;  %v1744_v58 = vpop.permute.xlu0 %1743 }
 0xaf9   :  { %v1927_v23 = vadd.f32 %v3888_v46, %v1744_v58  ;;  %v2021_v46 = vld [vmem:[%s4015_s2 + $0x70] sm:$0xff] }
 0xafb   :  { %v1941_v10 = vpop.f32.mrf.mxu3 }
 0xafc   :  { %v1942_v62 = vadd.f32 %v1941_v10, %v1764_v1  ;;  %v1740_v10 = vpop.permute.xlu2 %1739  ;;  %v2027_v1 = vld [vmem:[%s4015_s2 + $0xa0] sm:$0xff] }
 0xafe   :  { %v2001_v49 = vmax.f32 %v1942_v62, 0.0  ;;  %v2558_v62 = vld [vmem:[%s4018_s5 + $0x20] sm:$0xff] }
 0xb00   :  { %2427 = vmatmul.msk.f32.gmra.mxu3 %vm69_vm0, %v1737_v44 }
 0xb03   :  { %v1944_v5 = vpop.f32.mrf.mxu3 }
 0xb04   :  { %v1945_v3 = vadd.f32 %v1944_v5, %v1768_v21  ;;  %v1999_v5 = vmax.f32 %v1936_v45, 0.0 }
 0xb06   :  { %v2002_v12 = vmax.f32 %v1945_v3, 0.0  ;;  %v2020_v3 = vld [vmem:[%s4015_s2 + $0x68] sm:$0xff] }
 0xb0b   :  { %v1947_v59 = vpop.f32.mrf.mxu3 }
 0xb0c   :  { %v1948_v30 = vadd.f32 %v1947_v59, %v1772_v32  ;;  %v1930_v59 = vadd.f32 %v3894_v41, %v1748_v4 }
 0xb0e   :  { %v2003_v20 = vmax.f32 %v1948_v30, 0.0  ;;  %v1997_v13 = vmax.f32 %v1930_v59, 0.0 }
 0xb13   :  { %v1950_v55 = vpop.f32.mrf.mxu3 }
 0xb14   :  { %v1951_v27 = vadd.f32 %v1950_v55, %v1776_v53  ;;  %v1998_v55 = vmax.f32 %v1933_v2, 0.0 }
 0xb16   :  { %v2004_v57 = vmax.f32 %v1951_v27, 0.0 }
 0xb1b   :  { %v1953_v22 = vpop.f32.mrf.mxu3 }
 0xb1c   :  { %v1954_v36 = vadd.f32 %v1953_v22, %v1780_v50  ;;  %v1924_v22 = vadd.f32 %v3882_v47, %v1740_v10 }
 0xb1e   :  { %v2005_v54 = vmax.f32 %v1954_v36, 0.0  ;;  %v2029_v36 = vld [vmem:[%s4015_s2 + $0xb0] sm:$0xff] }
 0xb23   :  { %v1956_v43 = vpop.f32.mrf.mxu3 }
 0xb24   :  { %v1957_v56 = vadd.f32 %v1956_v43, %v1784_v51  ;;  %v1995_v43 = vmax.f32 %v1924_v22, 0.0  ;;  %v2023_v51 = vld [vmem:[%s4015_s2 + $0x80] sm:$0xff] }
 0xb26   :  { %v2006_v48 = vmax.f32 %v1957_v56, 0.0 }
 0xb2b   :  { %v1959_v31 = vpop.f32.mrf.mxu3 }
 0xb2c   :  { %v1960_v18 = vadd.f32 %v1959_v31, %v1788_v38  ;;  %v1824_v31 = vpop.permute.xlu1 %1823 }
 0xb2e   :  { %v2007_v60 = vmax.f32 %v1960_v18, 0.0  ;;  %v2556_v18 = vld [vmem:[%s4018_s5 + $0x8] sm:$0xff] }
 0xb33   :  { %v1962_v17 = vpop.f32.mrf.mxu3 }
 0xb34   :  { %v1963_v7 = vadd.f32 %v1962_v17, %v1792_v40  ;;  %v2025_v40 = vld [vmem:[%s4015_s2 + $0x90] sm:$0xff]  ;;  %v1820_v17 = vpop.permute.xlu0 %1819  ;;  %v1816_v50 = vpop.permute.xlu1 %1815 }
 0xb36   :  { %v2008_v0 = vmax.f32 %v1963_v7, 0.0 }
 0xb3b   :  { %v1965_v6 = vpop.f32.mrf.mxu3 }
 0xb3c   :  { %v1966_v26 = vadd.f32 %v1965_v6, %v1796_v63  ;;  %v1996_v63 = vmax.f32 %v1927_v23, 0.0  ;;  %v1808_v28 = vpop.permute.xlu0 %1807 }
 0xb3e   :  { %v2009_v25 = vmax.f32 %v1966_v26, 0.0 }
 0xb43   :  { %v1968_v61 = vpop.f32.mrf.mxu3 }
 0xb44   :  { %v1969_v9 = vadd.f32 %v1968_v61, %v1800_v37  ;;  %v2019_v37 = vld [vmem:[%s4015_s2 + $0x60] sm:$0xff] }
 0xb46   :  { %v2010_v16 = vmax.f32 %v1969_v9, 0.0  ;;  %v2602_v9 = vmov 9  }
 0xb47   :  { %2491 = vset.pattern.permute.xlu1 %v2602_v9  ;;  %2490 = vset.pattern.permute.xlu0 %v2602_v9 }
 0xb48   :  { %2073 = vmatpush.msrb.mxu2 %v2010_v16  ;;  %2040 = vperm.xlu1 %2491, %v3800_v33  }
 0xb49   :  { %2489 = vset.pattern.permute.xlu2 %v2602_v9  ;;  %2036 = vperm.xlu0 %2490, %v2556_v18   ;;  %v2562_v9 = vld [vmem:[%s4013_s0 + $0x18] sm:$0xff] }
 0xb4a   :  { %2074 = vmatpush.msrb.mxu2 %v2009_v25  ;;  %v1812_v25 = vpop.permute.xlu2 %1811  ;;  %2032 = vperm.xlu2 %2489, %v3815_v14  }
 0xb4b   :  { %v3920_v34 = vpop.f32.mrf.mxu3 }
 0xb4c   :  { %2075 = vmatpush.msrb.mxu2 %v2008_v0 }
 0xb4e   :  { %2076 = vmatpush.msrb.mxu2 %v2007_v60  ;;  %v1804_v60 = vpop.permute.xlu1 %1803 }
 0xb4f   :  { %v1972_v30 = vadd.f32 %v3920_v34, %v1804_v60  ;;  %v2557_v34 = vld [vmem:[%s4018_s5 + $0x28] sm:$0xff] }
 0xb50   :  { %2077 = vmatpush.msrb.mxu2 %v2006_v48  ;;  %2048 = vperm.xlu1 %2491, %v3534_v11   ;;  %v2022_v11 = vld [vmem:[%s4015_s2 + $0x78] sm:$0xff] }
 0xb52   :  { %2078 = vmatpush.msrb.mxu2 %v2005_v54  ;;  %2044 = vperm.xlu2 %2489, %v3789_v42  }
 0xb53   :  { %v3922_v24 = vpop.f32.mrf.mxu3 }
 0xb54   :  { %2079 = vmatpush.msrb.mxu2 %v2004_v57  ;;  %v1975_v48 = vadd.f32 %v3922_v24, %v1808_v28  ;;  %v2603_v57 = vmov 10   ;;  %v2026_v24 = vld [vmem:[%s4015_s2 + $0x98] sm:$0xff] }
 0xb55   :  { %2492 = vset.pattern.permute.xlu0 %v2603_v57 }
 0xb56   :  { %2080 = vmatpush.msrb.mxu2 %v2003_v20  ;;  %v2012_v54 = vmax.f32 %v1975_v48, 0.0  ;;  %2210 = vperm.xlu0 %2492, %v3815_v14   ;;  %v2604_v20 = vmov 11  }
 0xb58   :  { %2081 = vmatpush.msrb.mxu2 %v2002_v12  ;;  %2493 = vset.pattern.permute.xlu1 %v2603_v57  ;;  %v2030_v12 = vld [vmem:[%s4015_s2 + $0xb8] sm:$0xff] }
 0xb59   :  { %2214 = vperm.xlu1 %2493, %v2556_v18  }
 0xb5a   :  { %2082 = vmatpush.msrb.mxu2 %v2001_v49  ;;  %2052 = vperm.xlu2 %2489, %v2557_v34  }
 0xb5b   :  { %v1977_v44 = vpop.f32.mrf.mxu3 }
 0xb5c   :  { %2083 = vmatpush.msrb.mxu2 %v2000_v19  ;;  %v1978_v0 = vadd.f32 %v1977_v44, %v1812_v25 }
 0xb5e   :  { %2084 = vmatpush.msrb.mxu2 %v1999_v5  ;;  %v2013_v29 = vmax.f32 %v1978_v0, 0.0  ;;  %2230 = vperm.xlu0 %2492, %v2557_v34  }
 0xb60   :  { %2085 = vmatpush.msrb.mxu2 %v1998_v55 }
 0xb61   :  { %2222 = vperm.xlu1 %2493, %v3789_v42  }
 0xb62   :  { %2086 = vmatpush.msrb.mxu2 %v1997_v13  ;;  %2494 = vset.pattern.permute.xlu2 %v2603_v57 }
 0xb63   :  { %v1980_v15 = vpop.f32.mrf.mxu3  ;;  %2218 = vperm.xlu2 %2494, %v3800_v33  }
 0xb64   :  { %2087 = vmatpush.msrb.mxu2 %v1996_v63  ;;  %v1981_v52 = vadd.f32 %v1980_v15, %v1816_v50 }
 0xb66   :  { %2088 = vmatpush.msrb.mxu2 %v1995_v43  ;;  %v2014_v27 = vmax.f32 %v1981_v52, 0.0  ;;  %2497 = vset.pattern.permute.xlu0 %v2604_v20 }
 0xb67   :  { %2089 = vmatmul.f32.vlgmr.msrb.gmra.mxu2 %v2019_v37  ;;  %2248 = vperm.xlu0 %2497, %v3800_v33  }
 0xb69   :  { %2495 = vset.pattern.permute.xlu1 %v2604_v20 }
 0xb6a   :  { %2240 = vperm.xlu1 %2495, %v3815_v14  }
 0xb6b   :  { %v1983_v41 = vpop.f32.mrf.mxu3  ;;  %2226 = vperm.xlu2 %2494, %v2558_v62  }
 0xb6c   :  { %v1984_v7 = vadd.f32 %v1983_v41, %v1820_v17  ;;  %v2605_v41 = vmov 48.0  }
 0xb6d   :  { %2530 = vrcp.f32 %v2605_v41 }
 0xb6e   :  { %v2015_v56 = vmax.f32 %v1984_v7, 0.0 }
 0xb6f   :  { %2092 = vmatmul.f32.gmra.mxu2 %v2021_v46 }
 0xb72   :  { %2252 = vperm.xlu1 %2495, %v3789_v42  }
 0xb73   :  { %v1986_v47 = vpop.f32.mrf.mxu3  ;;  %2496 = vset.pattern.permute.xlu2 %v2604_v20 }
 0xb74   :  { %v1987_v61 = vadd.f32 %v1986_v47, %v1824_v31  ;;  %2244 = vperm.xlu2 %2496, %v2556_v18   ;;  %v2559_v47 = vld [vmem:[%s4013_s0 + $0x8] sm:$0xff] }
 0xb76   :  { %v2016_v16 = vmax.f32 %v1987_v61, 0.0  ;;  %v2531_v61 = vpop.eup %2530 }
 0xb77   :  { %2095 = vmatmul.f32.gmra.mxu2 %v2023_v51  ;;  %v2161_v28 = vmul.f32 48.0, %v2531_v61  ;;  %vm2165_vm0 = vweird.f32 %v2531_v61 }
 0xb79   :  { %v2162_v48 = vsub.f32 1.0, %v2161_v28 }
 0xb7a   :  { %2260 = vperm.xlu1 %2495, %v2557_v34  }
 0xb7b   :  { %v1989_v38 = vpop.f32.mrf.mxu3 }
 0xb7c   :  { %v1990_v6 = vadd.f32 %v1989_v38, %v1828_v39  ;;  %v2024_v39 = vld [vmem:[%s4015_s2 + $0x88] sm:$0xff]  ;;  %2256 = vperm.xlu2 %2496, %v2558_v62  }
 0xb7e   :  { %v2017_v21 = vmax.f32 %v1990_v6, 0.0 }
 0xb7f   :  { %2098 = vmatmul.f32.gmra.mxu2 %v2025_v40  ;;  %v2560_v40 = vld [vmem:[%s4013_s0] sm:$0xff] }
 0xb83   :  { %v1992_v53 = vpop.f32.mrf.mxu3 }
 0xb84   :  { %v1993_v32 = vadd.f32 %v1992_v53, %v1832_v8  ;;  %v2011_v8 = vmax.f32 %v1972_v30, 0.0  ;;  %v2561_v53 = vld [vmem:[%s4013_s0 + $0x10] sm:$0xff] }
 0xb86   :  { %v2018_v26 = vmax.f32 %v1993_v32, 0.0 }
 0xb87   :  { %2101 = vmatmul.f32.gmra.mxu2 %v2027_v1 }
 0xb88   :  { %2116 = vmatpush.msra.mxu1 %v2018_v26 }
 0xb8a   :  { %2117 = vmatpush.msra.mxu1 %v2017_v21 }
 0xb8c   :  { %2118 = vmatpush.msra.mxu1 %v2016_v16  ;;  %v2563_v16 = vld [vmem:[%s4013_s0 + $0x20] sm:$0xff] }
 0xb8e   :  { %2119 = vmatpush.msra.mxu1 %v2015_v56 }
 0xb8f   :  { %2104 = vmatmul.f32.gmra.mxu2 %v2029_v36  ;;  %v2564_v36 = vld [vmem:[%s4013_s0 + $0x28] sm:$0xff]  ;;  %s2606_s0 = smov [#allocation2]  }
 0xb90   :  { %2120 = vmatpush.msra.mxu1 %v2014_v27  ;;  %s2279_s24 = sshll.u32 %s2606_s0, 4  ;;  %s2280_s24 = int_to_ptr.vmem [resolvable:$true] %s2279_s24 }
 0xb92   :  { %2121 = vmatpush.msra.mxu1 %v2013_v29 }
 0xb94   :  { %2122 = vmatpush.msra.mxu1 %v2012_v54  ;;  %v2163_v54 = vmul.f32 %v2531_v61, %v2162_v48 }
 0xb96   :  { %2123 = vmatpush.msra.mxu1 %v2011_v8  ;;  %v2164_v34 = vadd.f32 %v2531_v61, %v2163_v54 }
 0xb97   :  { %2428 = vmatmul.msk.f32.vlgmr.msra.gmra.mxu1 %vm1352_vm6, %v2020_v3 }
 0xb9f   :  { %2429 = vmatmul.msk.f32.gmra.mxu1 %vm1352_vm6, %v2022_v11 }
 0xba4   :  { %v2033_v58 = vpop.permute.xlu2 %2032 }
 0xba7   :  { %2430 = vmatmul.msk.f32.gmra.mxu1 %vm1352_vm6, %v2024_v39  ;;  %v2166_v39 = vsel %vm2165_vm0, %v2531_v61, %v2164_v34 }
 0xbac   :  { %v2045_v10 = vpop.permute.xlu2 %2044 }
 0xbaf   :  { %2431 = vmatmul.msk.f32.gmra.mxu1 %vm1352_vm6, %v2026_v24 }
 0xbb4   :  { %v2053_v32 = vpop.permute.xlu2 %2052 }
 0xbb7   :  { %2432 = vmatmul.msk.f32.gmra.mxu1 %vm1352_vm6, %v2028_v35 }
 0xbba   :  { %v2041_v44 = vpop.permute.xlu1 %2040 }
 0xbbb   :  { %v2037_v5 = vpop.permute.xlu0 %2036 }
 0xbbf   :  { %2433 = vmatmul.msk.f32.gmra.mxu1 %vm1352_vm6, %v2030_v12 }
 0xbc2   :  { %v2049_v15 = vpop.permute.xlu1 %2048 }
 0xbea   :  { %v2090_v14 = vpop.f32.mrf.mxu2 }
 0xbeb   :  { %v2091_v23 = vadd.f32 %v2090_v14, %v2033_v58 }
 0xbf2   :  { %v2093_v33 = vpop.f32.mrf.mxu2 }
 0xbf3   :  { %v2094_v42 = vadd.f32 %v2093_v33, %v2037_v5 }
 0xbfa   :  { %v2096_v45 = vpop.f32.mrf.mxu2 }
 0xbfb   :  { %v2097_v22 = vadd.f32 %v2096_v45, %v2041_v44 }
 0xc02   :  { %v2099_v19 = vpop.f32.mrf.mxu2 }
 0xc03   :  { %v2100_v63 = vadd.f32 %v2099_v19, %v2045_v10 }
 0xc0a   :  { %v2102_v55 = vpop.f32.mrf.mxu2 }
 0xc0b   :  { %v2103_v38 = vadd.f32 %v2102_v55, %v2049_v15 }
 0xc12   :  { %v2105_v1 = vpop.f32.mrf.mxu2 }
 0xc13   :  { %v2106_v18 = vadd.f32 %v2105_v1, %v2053_v32 }
 0xc14   :  { %v2125_v49 = vpop.f32.mrf.mxu1 }
 0xc15   :  { %v2126_v43 = vadd.f32 %v2125_v49, %v2091_v23  ;;  %v2215_v23 = vpop.permute.xlu1 %2214 }
 0xc17   :  { %v2143_v17 = vadd.f32 %v2560_v40, %v2126_v43 }
 0xc1c   :  { %v2128_v4 = vpop.f32.mrf.mxu1 }
 0xc1d   :  { %v2129_v13 = vadd.f32 %v2128_v4, %v2094_v42 }
 0xc1f   :  { %v2144_v51 = vadd.f32 %v2559_v47, %v2129_v13 }
 0xc21   :  { %v2149_v26 = vadd.f32 %v2144_v51, %v2143_v17 }
 0xc24   :  { %v2131_v2 = vpop.f32.mrf.mxu1 }
 0xc25   :  { %v2132_v37 = vadd.f32 %v2131_v2, %v2097_v22 }
 0xc27   :  { %v2145_v50 = vadd.f32 %v2561_v53, %v2132_v37  ;;  %v2223_v37 = vpop.permute.xlu1 %2222 }
 0xc29   :  { %v2150_v7 = vadd.f32 %v2149_v26, %v2145_v50 }
 0xc2c   :  { %v2134_v59 = vpop.f32.mrf.mxu1 }
 0xc2d   :  { %v2135_v31 = vadd.f32 %v2134_v59, %v2100_v63 }
 0xc2f   :  { %v2146_v21 = vadd.f32 %v2562_v9, %v2135_v31  ;;  %v2211_v31 = vpop.permute.xlu0 %2210 }
 0xc31   :  { %v2151_v56 = vadd.f32 %v2150_v7, %v2146_v21 }
 0xc34   :  { %v2137_v46 = vpop.f32.mrf.mxu1 }
 0xc35   :  { %v2138_v6 = vadd.f32 %v2137_v46, %v2103_v38  ;;  %v2219_v46 = vpop.permute.xlu2 %2218  ;;  %v2241_v38 = vpop.permute.xlu1 %2240 }
 0xc37   :  { %v2147_v52 = vadd.f32 %v2563_v16, %v2138_v6  ;;  %v2231_v32 = vpop.permute.xlu0 %2230 }
 0xc39   :  { %v2152_v27 = vadd.f32 %v2151_v56, %v2147_v52 }
 0xc3c   :  { %v2140_v25 = vpop.f32.mrf.mxu1 }
 0xc3d   :  { %v2141_v0 = vadd.f32 %v2140_v25, %v2106_v18  ;;  %v2227_v40 = vpop.permute.xlu2 %2226  ;;  %v2253_v61 = vpop.permute.xlu1 %2252 }
 0xc3f   :  { %v2148_v60 = vadd.f32 %v2564_v36, %v2141_v0 }
 0xc41   :  { %v2153_v29 = vadd.f32 %v2152_v27, %v2148_v60  ;;  %v2249_v27 = vpop.permute.xlu0 %2248 }
 0xc43   :  { %v2154_v30 = vrot.slane %v2153_v29, 4 }
 0xc45   :  { %v2155_v8 = vadd.f32 %v2154_v30, %v2153_v29  ;;  %v2245_v26 = vpop.permute.xlu2 %2244  ;;  %v2261_v34 = vpop.permute.xlu1 %2260 }
 0xc47   :  { %v2156_v3 = vrot.slane %v2155_v8, 2 }
 0xc49   :  { %v2157_v11 = vadd.f32 %v2156_v3, %v2155_v8 }
 0xc4b   :  { %v2158_v57 = vrot.slane %v2157_v11, 1 }
 0xc4d   :  { %v2159_v24 = vadd.f32 %v2158_v57, %v2157_v11  ;;  %v2257_v57 = vpop.permute.xlu2 %2256 }
 0xc4f   :  { %v2167_v62 = vmul.f32 %v2166_v39, %v2159_v24 }
 0xc51   :  { %v2168_v20 = vsub.f32 %v2143_v17, %v2167_v62  ;;  %v2170_v35 = vsub.f32 %v2145_v50, %v2167_v62  ;;  %v2169_v12 = vsub.f32 %v2144_v51, %v2167_v62  ;;  %v2171_v33 = vsub.f32 %v2146_v21, %v2167_v62 }
 0xc52   :  { %v2172_v45 = vsub.f32 %v2147_v52, %v2167_v62  ;;  %v2173_v19 = vsub.f32 %v2148_v60, %v2167_v62 }
 0xc53   :  { %v2174_v14 = vmul.f32 %v2168_v20, %v2168_v20  ;;  %v2175_v49 = vmul.f32 %v2169_v12, %v2169_v12  ;;  %v2176_v4 = vmul.f32 %v2170_v35, %v2170_v35  ;;  %v2177_v58 = vmul.f32 %v2171_v33, %v2171_v33 }
 0xc54   :  { %v2178_v5 = vmul.f32 %v2172_v45, %v2172_v45  ;;  %v2179_v42 = vmul.f32 %v2173_v19, %v2173_v19 }
 0xc55   :  { %v2180_v2 = vadd.f32 %v2175_v49, %v2174_v14 }
 0xc57   :  { %v2181_v44 = vadd.f32 %v2180_v2, %v2176_v4 }
 0xc59   :  { %v2182_v59 = vadd.f32 %v2181_v44, %v2177_v58 }
 0xc5b   :  { %v2183_v10 = vadd.f32 %v2182_v59, %v2178_v5 }
 0xc5d   :  { %v2184_v55 = vadd.f32 %v2183_v10, %v2179_v42 }
 0xc5f   :  { %v2185_v22 = vrot.slane %v2184_v55, 4 }
 0xc61   :  { %v2186_v13 = vadd.f32 %v2185_v22, %v2184_v55 }
 0xc63   :  { %v2187_v63 = vrot.slane %v2186_v13, 2 }
 0xc65   :  { %v2188_v15 = vadd.f32 %v2187_v63, %v2186_v13 }
 0xc67   :  { %v2189_v43 = vrot.slane %v2188_v15, 1 }
 0xc69   :  { %v2190_v41 = vadd.f32 %v2189_v43, %v2188_v15 }
 0xc6b   :  { %v2191_v47 = vmul.f32 %v2190_v41, %v2166_v39 }
 0xc6d   :  { %v2192_v51 = vadd.f32 1e-05, %v2191_v47 }
 0xc6f   :  { %2532 = vrsqrt.f32 %v2192_v51  ;;  %vm2199_vm11 = vweird.f32 %v2192_v51 }
 0xc75   :  { %v2533_v17 = vpop.eup %2532 }
 0xc76   :  { %v2194_v53 = vmul.f32 %v2533_v17, %v2192_v51  ;;  %vm2200_vm6 = vweird.f32 %v2533_v17 }
 0xc77   :  { %vm2201_vm12 = vmor %vm2199_vm11, %vm2200_vm6 }
 0xc78   :  { %v2195_v50 = vmul.f32 %v2533_v17, %v2194_v53 }
 0xc7a   :  { %v2196_v6 = vmul.f32 0.5, %v2195_v50 }
 0xc7c   :  { %v2197_v1 = vsub.f32 1.5, %v2196_v6 }
 0xc7e   :  { %v2198_v9 = vmul.f32 %v2533_v17, %v2197_v1 }
 0xc80   :  { %v2202_v21 = vsel %vm2201_vm12, %v2533_v17, %v2198_v9 }
 0xc81   :  { %v2204_v7 = vmul.f32 %v2202_v21, %v2169_v12  ;;  %v2205_v16 = vmul.f32 %v2202_v21, %v2170_v35  ;;  %v2206_v52 = vmul.f32 %v2202_v21, %v2171_v33  ;;  %v2203_v18 = vmul.f32 %v2202_v21, %v2168_v20 }
 0xc82   :  { %v2207_v25 = vmul.f32 %v2202_v21, %v2172_v45  ;;  %v2208_v28 = vmul.f32 %v2202_v21, %v2173_v19 }
 0xc83   :  { %v2234_v56 = vmul.f32 %v2215_v23, %v2204_v7  ;;  %v2235_v0 = vmul.f32 %v2219_v46, %v2205_v16  ;;  %v2236_v36 = vmul.f32 %v2223_v37, %v2206_v52  ;;  %v2233_v60 = vmul.f32 %v2211_v31, %v2203_v18 }
 0xc84   :  { %v2237_v48 = vmul.f32 %v2227_v40, %v2207_v25  ;;  %v2238_v29 = vmul.f32 %v2231_v32, %v2208_v28 }
 0xc85   :  { %v2263_v30 = vadd.f32 %v2241_v38, %v2233_v60  ;;  %v2264_v54 = vadd.f32 %v2245_v26, %v2234_v56  ;;  %v2266_v8 = vadd.f32 %v2253_v61, %v2236_v36  ;;  %v2265_v3 = vadd.f32 %v2249_v27, %v2235_v0 }
 0xc86   :  { %v2268_v11 = vadd.f32 %v2261_v34, %v2238_v29  ;;  %v2267_v39 = vadd.f32 %v2257_v57, %v2237_v48 }
 0xc87   :  { %2269 = vst [vmem:[#allocation2] sm:$0xff] %v2263_v30 }
 0xc88   :  { %2270 = vst [vmem:[#allocation2 + $0x8] sm:$0xff] %v2264_v54 }
 0xc89   :  { %2272 = vst [vmem:[#allocation2 + $0x18] sm:$0xff] %v2266_v8 }
 0xc8a   :  { %2271 = vst [vmem:[#allocation2 + $0x10] sm:$0xff] %v2265_v3 }
 0xc8b   :  { %2274 = vst [vmem:[#allocation2 + $0x28] sm:$0xff] %v2268_v11 }
 0xc8c   :  { %2273 = vst [vmem:[#allocation2 + $0x20] sm:$0xff] %v2267_v39 }
 0xc8d   :  { %2287 = dma.vmem_to_hbm [thread:$0]  %s2280_s24, 768, %s2282_s27, [#allocation3], %s2607_s28, %s2607_s28, %s2608_s29  }
 0xc8e   :  { %2589 = dma.done.wait [#allocation3], 768  }
 0xc8f   :  { %2590 = vsyncadd [#allocation3], 4294966528 }
 0xc90   :  { %2292 = vsyncpa [#allocation3], 1 }

</bundles_post_ra>
